<compile_context>
chip_gen: v7x
topology: tpu7x:2x2x1
jax: 0.10.0
libtpu: 0.0.40
codegen_flags: <defaults>
</compile_context>

<pallas_src>
import functools
import math

import jax
import jax.numpy as jnp
from jax.experimental import pallas as pl
from jax.experimental.pallas import tpu as pltpu  # noqa: F401  (TPU backend)

# ----------------------------- small BERT config -----------------------------
VOCAB = 100
TYPE_VOCAB = 2
MAX_POS = 32
HIDDEN = 32
N_HEADS = 4
HEAD_DIM = HIDDEN // N_HEADS
INTERMEDIATE = 64
N_LAYERS = 2
LN_EPS = 1e-12
MXU_DTYPE = jnp.bfloat16   # bf16 MXU operands; f32 accumulation everywhere


# ------------------------------ fused Pallas kernel ---------------------------
def _encoder_kernel(emb_ref, mask_ref, eg_ref, eb_ref,
                    qkv_w_ref, qkv_b_ref, ao_w_ref, ao_b_ref,
                    ln1_g_ref, ln1_b_ref, i_w_ref, i_b_ref,
                    o_w_ref, o_b_ref, ln2_g_ref, ln2_b_ref,
                    pool_w_ref, pool_b_ref,
                    last_ref, pooled_ref, *, batch, seq):
    """Whole BERT encoder + pooler, fully VMEM-resident.

    emb:   [B*S, H]   summed (word+pos+type) embeddings, pre-LayerNorm
    mask:  [B, 1, S]  additive attention mask
    layer weights are stacked along a leading [N_LAYERS] axis.
    outputs: last [B*S, H], pooled [B, H]
    """

    def layernorm(h, g, b):
        mu = jnp.mean(h, axis=-1, keepdims=True)
        d = h - mu
        var = jnp.mean(d * d, axis=-1, keepdims=True)
        return d * jax.lax.rsqrt(var + LN_EPS) * g + b

    def matmul(x, w):
        # bf16 operands feed the MXU at full rate on all generations; keep the
        # accumulator / downstream elementwise math in f32.
        return jnp.dot(x.astype(MXU_DTYPE), w.astype(MXU_DTYPE),
                       preferred_element_type=jnp.float32)

    x = layernorm(emb_ref[...], eg_ref[...], eb_ref[...])        # [B*S, H]
    add_mask = mask_ref[...]                                     # [B, 1, S]
    scale = 1.0 / math.sqrt(HEAD_DIM)

    for l in range(N_LAYERS):                                    # static unroll
        # ---- fused QKV projection: one matmul against [H, 3H] --------------
        qkv = matmul(x, qkv_w_ref[l]) + qkv_b_ref[l]             # [B*S, 3H]

        # ---- multi-head attention, all heads/batches inside this kernel ----
        ctx_heads = []
        for h in range(N_HEADS):                                 # static unroll
            lo = h * HEAD_DIM
            qh = qkv[:, lo:lo + HEAD_DIM].reshape(batch, seq, HEAD_DIM)
            kh = qkv[:, HIDDEN + lo:HIDDEN + lo + HEAD_DIM].reshape(
                batch, seq, HEAD_DIM)
            vh = qkv[:, 2 * HIDDEN + lo:2 * HIDDEN + lo + HEAD_DIM].reshape(
                batch, seq, HEAD_DIM)
            # scores via contraction dims (no explicit k.T / XLU transpose)
            s = jax.lax.dot_general(
                qh, kh, (((2,), (2,)), ((0,), (0,))),
                preferred_element_type=jnp.float32)              # [B, S, S]
            s = s * scale + add_mask
            s = s - jnp.max(s, axis=-1, keepdims=True)
            p = jnp.exp(s)
            # approx reciprocal -> EUP slot, off the VPU critical path
            p = p * pl.reciprocal(jnp.sum(p, axis=-1, keepdims=True),
                                  approx=True)
            ctx_h = jax.lax.dot_general(
                p, vh, (((2,), (1,)), ((0,), (0,))),
                preferred_element_type=jnp.float32)              # [B, S, dh]
            ctx_heads.append(ctx_h.reshape(batch * seq, HEAD_DIM))
        ctx = jnp.concatenate(ctx_heads, axis=-1)                # [B*S, H]

        # ---- attention output projection + residual LayerNorm --------------
        attn_out = matmul(ctx, ao_w_ref[l]) + ao_b_ref[l]
        x = layernorm(attn_out + x, ln1_g_ref[l], ln1_b_ref[l])

        # ---- feed-forward (erf-GELU) + residual LayerNorm -------------------
        inter = matmul(x, i_w_ref[l]) + i_b_ref[l]               # [B*S, I]
        inter = 0.5 * inter * (1.0 + jax.lax.erf(inter * (1.0 / math.sqrt(2.0))))
        ffn = matmul(inter, o_w_ref[l]) + o_b_ref[l]             # [B*S, H]
        x = layernorm(ffn + x, ln2_g_ref[l], ln2_b_ref[l])

    last_ref[...] = x.astype(last_ref.dtype)

    # ---- pooler: tanh(dense(first token of each sequence)) ------------------
    cls = jnp.concatenate([x[b * seq:b * seq + 1, :] for b in range(batch)],
                          axis=0)                                # [B, H]
    pooled = jnp.tanh(matmul(cls, pool_w_ref[...]) + pool_b_ref[...])
    pooled_ref[...] = pooled.astype(pooled_ref.dtype)


def run_encoder(params, emb, add_mask, batch, seq):
    kernel = functools.partial(_encoder_kernel, batch=batch, seq=seq)
    last2d, pooled = pl.pallas_call(
        kernel,
        out_shape=(jax.ShapeDtypeStruct((batch * seq, HIDDEN), jnp.float32),
                   jax.ShapeDtypeStruct((batch, HIDDEN), jnp.float32)),
    )(emb, add_mask,
      params["emb_ln_g"], params["emb_ln_b"],
      params["qkv_w"], params["qkv_b"],
      params["ao_w"], params["ao_b"],
      params["ln1_g"], params["ln1_b"],
      params["i_w"], params["i_b"],
      params["o_w"], params["o_b"],
      params["ln2_g"], params["ln2_b"],
      params["pool_w"], params["pool_b"])
    return last2d, pooled


# ------------------------------ parameter init ---------------------------------
def init_params(key):
    def nrm(k, shape):
        return 0.02 * jax.random.normal(k, shape, dtype=jnp.float32)

    keys = jax.random.split(key, 4 + N_LAYERS)
    params = {
        "word_emb": nrm(keys[0], (VOCAB, HIDDEN)),
        "pos_emb": nrm(keys[1], (MAX_POS, HIDDEN)),
        "type_emb": nrm(keys[2], (TYPE_VOCAB, HIDDEN)),
        "emb_ln_g": jnp.ones((1, HIDDEN), jnp.float32),
        "emb_ln_b": jnp.zeros((1, HIDDEN), jnp.float32),
        "pool_w": nrm(keys[3], (HIDDEN, HIDDEN)),
        "pool_b": jnp.zeros((1, HIDDEN), jnp.float32),
    }
    qkv_w, ao_w, i_w, o_w = [], [], [], []
    for l in range(N_LAYERS):
        lk = jax.random.split(keys[4 + l], 6)
        # fused QKV weight: concat of Q, K, V projections along output dim
        qkv_w.append(jnp.concatenate(
            [nrm(lk[0], (HIDDEN, HIDDEN)),
             nrm(lk[1], (HIDDEN, HIDDEN)),
             nrm(lk[2], (HIDDEN, HIDDEN))], axis=1))
        ao_w.append(nrm(lk[3], (HIDDEN, HIDDEN)))
        i_w.append(nrm(lk[4], (HIDDEN, INTERMEDIATE)))
        o_w.append(nrm(lk[5], (INTERMEDIATE, HIDDEN)))
    params.update({
        "qkv_w": jnp.stack(qkv_w),                                 # [L, H, 3H]
        "qkv_b": jnp.zeros((N_LAYERS, 1, 3 * HIDDEN), jnp.float32),
        "ao_w": jnp.stack(ao_w),                                   # [L, H, H]
        "ao_b": jnp.zeros((N_LAYERS, 1, HIDDEN), jnp.float32),
        "ln1_g": jnp.ones((N_LAYERS, 1, HIDDEN), jnp.float32),
        "ln1_b": jnp.zeros((N_LAYERS, 1, HIDDEN), jnp.float32),
        "i_w": jnp.stack(i_w),                                     # [L, H, I]
        "i_b": jnp.zeros((N_LAYERS, 1, INTERMEDIATE), jnp.float32),
        "o_w": jnp.stack(o_w),                                     # [L, I, H]
        "o_b": jnp.zeros((N_LAYERS, 1, HIDDEN), jnp.float32),
        "ln2_g": jnp.ones((N_LAYERS, 1, HIDDEN), jnp.float32),
        "ln2_b": jnp.zeros((N_LAYERS, 1, HIDDEN), jnp.float32),
    })
    return params


# ------------------------------ forward (wrapper) -------------------------------
def bert_encoder_forward(params, bert1, bert2, sent_l1, sent_l2):
    # bert_tok = cat([bert1, bert2[:, 1:]], 1)
    bert_tok = jnp.concatenate([bert1, bert2[:, 1:]], axis=1)     # [B, S]
    B, S = bert_tok.shape

    # get_seg_mask(): mask all ones, seg = [0]*L1 ++ [1]*(L2-1)
    mask = jnp.ones((B, S), dtype=jnp.int32)
    seg = jnp.concatenate(
        [jnp.zeros((B, sent_l1), jnp.int32),
         jnp.ones((B, sent_l2 - 1), jnp.int32)], axis=1)
    assert seg.shape[1] == bert_tok.shape[1]

    # embedding table lookups are glue in plain JAX; everything else is fused
    pos = jnp.arange(S, dtype=jnp.int32)[None, :]
    emb = (params["word_emb"][bert_tok]
           + params["pos_emb"][pos]
           + params["type_emb"][seg]).astype(jnp.float32)
    emb = emb.reshape(B * S, HIDDEN)

    # BERT-style extended additive attention mask
    add_mask = ((1.0 - mask.astype(jnp.float32)) * -10000.0).reshape(B, 1, S)

    last2d, pooled = run_encoder(params, emb, add_mask, B, S)

    last = last2d.reshape(B, S, HIDDEN)
    # last = last + pooled.unsqueeze(1) * self.zero  (zero tensor, kept for semantics)
    zero = jnp.zeros((1,), jnp.float32)
    last = last + pooled[:, None, :] * zero
    return last


# ------------------------------------ main ---------------------------------------
if __name__ == "__main__":
    key = jax.random.PRNGKey(0)
    pkey, k1, k2 = jax.random.split(key, 3)
    params = init_params(pkey)

    batch_l, sent_l1, sent_l2 = 2, 5, 4        # -> S = 5 + 4 - 1 = 8
    bert1 = jax.random.randint(k1, (batch_l, sent_l1), 0, VOCAB, dtype=jnp.int32)
    bert2 = jax.random.randint(k2, (batch_l, sent_l2), 0, VOCAB, dtype=jnp.int32)

    fwd = jax.jit(bert_encoder_forward, static_argnums=(3, 4))
    last = fwd(params, bert1, bert2, sent_l1, sent_l2)
    last = jax.block_until_ready(last)
    assert last.shape == (batch_l, sent_l1 + sent_l2 - 1, HIDDEN)
    assert jnp.all(jnp.isfinite(last))
    print("KERNEL_OK")
</pallas_src>

<mosaic_0001>
module attributes {stable_mosaic.version = 11 : i64} {
  func.func @_encoder_kernel(%arg0: memref<16x32xf32, #tpu.memory_space<vmem>>, %arg1: memref<2x1x8xf32, #tpu.memory_space<vmem>>, %arg2: memref<1x32xf32, #tpu.memory_space<vmem>>, %arg3: memref<1x32xf32, #tpu.memory_space<vmem>>, %arg4: memref<2x32x96xf32, #tpu.memory_space<vmem>>, %arg5: memref<2x1x96xf32, #tpu.memory_space<vmem>>, %arg6: memref<2x32x32xf32, #tpu.memory_space<vmem>>, %arg7: memref<2x1x32xf32, #tpu.memory_space<vmem>>, %arg8: memref<2x1x32xf32, #tpu.memory_space<vmem>>, %arg9: memref<2x1x32xf32, #tpu.memory_space<vmem>>, %arg10: memref<2x32x64xf32, #tpu.memory_space<vmem>>, %arg11: memref<2x1x64xf32, #tpu.memory_space<vmem>>, %arg12: memref<2x64x32xf32, #tpu.memory_space<vmem>>, %arg13: memref<2x1x32xf32, #tpu.memory_space<vmem>>, %arg14: memref<2x1x32xf32, #tpu.memory_space<vmem>>, %arg15: memref<2x1x32xf32, #tpu.memory_space<vmem>>, %arg16: memref<32x32xf32, #tpu.memory_space<vmem>>, %arg17: memref<1x32xf32, #tpu.memory_space<vmem>>, %arg18: memref<16x32xf32, #tpu.memory_space<vmem>>, %arg19: memref<2x32xf32, #tpu.memory_space<vmem>>) attributes {dimension_semantics = [], scalar_prefetch = 0 : i64, scratch_operands = 0 : i64, tpu.core_type = #tpu.core_type<tc>} {
    %c0 = arith.constant 0 : index
    %c0_0 = arith.constant 0 : index
    %0 = vector.load %arg0[%c0, %c0_0] : memref<16x32xf32, #tpu.memory_space<vmem>>, vector<16x32xf32>
    %c0_1 = arith.constant 0 : index
    %c0_2 = arith.constant 0 : index
    %1 = vector.load %arg2[%c0_1, %c0_2] : memref<1x32xf32, #tpu.memory_space<vmem>>, vector<1x32xf32>
    %c0_3 = arith.constant 0 : index
    %c0_4 = arith.constant 0 : index
    %2 = vector.load %arg3[%c0_3, %c0_4] : memref<1x32xf32, #tpu.memory_space<vmem>>, vector<1x32xf32>
    %cst = arith.constant dense<0.000000e+00> : vector<16xf32>
    %3 = vector.multi_reduction <add>, %0, %cst [1] : vector<16x32xf32> to vector<16xf32>
    %4 = vector.shape_cast %3 : vector<16xf32> to vector<16x1xf32>
    %cst_5 = arith.constant 3.200000e+01 : f32
    %5 = vector.broadcast %cst_5 : f32 to vector<16x1xf32>
    %6 = arith.divf %4, %5 : vector<16x1xf32>
    %7 = vector.broadcast %6 : vector<16x1xf32> to vector<16x32xf32>
    %8 = arith.subf %0, %7 : vector<16x32xf32>
    %9 = arith.mulf %8, %8 : vector<16x32xf32>
    %cst_6 = arith.constant dense<0.000000e+00> : vector<16xf32>
    %10 = vector.multi_reduction <add>, %9, %cst_6 [1] : vector<16x32xf32> to vector<16xf32>
    %11 = vector.shape_cast %10 : vector<16xf32> to vector<16x1xf32>
    %cst_7 = arith.constant 3.200000e+01 : f32
    %12 = vector.broadcast %cst_7 : f32 to vector<16x1xf32>
    %13 = arith.divf %11, %12 : vector<16x1xf32>
    %cst_8 = arith.constant 9.99999996E-13 : f32
    %14 = vector.broadcast %cst_8 : f32 to vector<16x1xf32>
    %15 = arith.addf %13, %14 : vector<16x1xf32>
    %16 = math.rsqrt %15 : vector<16x1xf32>
    %17 = vector.broadcast %16 : vector<16x1xf32> to vector<16x32xf32>
    %18 = arith.mulf %8, %17 : vector<16x32xf32>
    %19 = vector.broadcast %1 : vector<1x32xf32> to vector<16x32xf32>
    %20 = arith.mulf %18, %19 : vector<16x32xf32>
    %21 = vector.broadcast %2 : vector<1x32xf32> to vector<16x32xf32>
    %22 = arith.addf %20, %21 : vector<16x32xf32>
    %c0_9 = arith.constant 0 : index
    %c0_10 = arith.constant 0 : index
    %c0_11 = arith.constant 0 : index
    %23 = vector.load %arg1[%c0_9, %c0_10, %c0_11] : memref<2x1x8xf32, #tpu.memory_space<vmem>>, vector<2x1x8xf32>
    %c0_12 = arith.constant 0 : index
    %c0_13 = arith.constant 0 : index
    %c0_14 = arith.constant 0 : index
    %24 = vector.load %arg4[%c0_12, %c0_13, %c0_14] : memref<2x32x96xf32, #tpu.memory_space<vmem>>, vector<1x32x96xf32>
    %25 = vector.shape_cast %24 : vector<1x32x96xf32> to vector<32x96xf32>
    %26 = arith.truncf %22 : vector<16x32xf32> to vector<16x32xbf16>
    %27 = arith.truncf %25 : vector<32x96xf32> to vector<32x96xbf16>
    %cst_15 = arith.constant dense<0.000000e+00> : vector<16x96xf32>
    %28 = tpu.matmul %26, %27, %cst_15 {dimension_numbers = #tpu.dot_dimension_numbers<[1], [0], [0], [1], [0, 0, 1, 1], [], []>} : vector<16x32xbf16>, vector<32x96xbf16>, vector<16x96xf32> -> vector<16x96xf32>
    %c0_16 = arith.constant 0 : index
    %c0_17 = arith.constant 0 : index
    %c0_18 = arith.constant 0 : index
    %29 = vector.load %arg5[%c0_16, %c0_17, %c0_18] : memref<2x1x96xf32, #tpu.memory_space<vmem>>, vector<1x1x96xf32>
    %30 = vector.shape_cast %29 : vector<1x1x96xf32> to vector<1x96xf32>
    %31 = vector.broadcast %30 : vector<1x96xf32> to vector<16x96xf32>
    %32 = arith.addf %28, %31 : vector<16x96xf32>
    %33 = vector.extract_strided_slice %32 {offsets = [0, 0], sizes = [16, 8], strides = [1, 1]} : vector<16x96xf32> to vector<16x8xf32>
    %34 = vector.shape_cast %33 : vector<16x8xf32> to vector<2x8x8xf32>
    %35 = vector.extract_strided_slice %32 {offsets = [0, 32], sizes = [16, 8], strides = [1, 1]} : vector<16x96xf32> to vector<16x8xf32>
    %36 = vector.shape_cast %35 : vector<16x8xf32> to vector<2x8x8xf32>
    %37 = vector.extract_strided_slice %32 {offsets = [0, 64], sizes = [16, 8], strides = [1, 1]} : vector<16x96xf32> to vector<16x8xf32>
    %38 = vector.shape_cast %37 : vector<16x8xf32> to vector<2x8x8xf32>
    %cst_19 = arith.constant dense<0.000000e+00> : vector<2x8x8xf32>
    %39 = tpu.matmul %34, %36, %cst_19 {dimension_numbers = #tpu.dot_dimension_numbers<[2], [2], [1], [1], [0, 0, 0, 1, 1, 1], [0], [0]>} : vector<2x8x8xf32>, vector<2x8x8xf32>, vector<2x8x8xf32> -> vector<2x8x8xf32>
    %cst_20 = arith.constant 0.353553385 : f32
    %40 = vector.broadcast %cst_20 : f32 to vector<2x8x8xf32>
    %41 = arith.mulf %39, %40 : vector<2x8x8xf32>
    %42 = vector.broadcast %23 : vector<2x1x8xf32> to vector<2x8x8xf32>
    %43 = arith.addf %41, %42 : vector<2x8x8xf32>
    %cst_21 = arith.constant dense<0xFF800000> : vector<2x8xf32>
    %44 = vector.multi_reduction <maximumf>, %43, %cst_21 [2] : vector<2x8x8xf32> to vector<2x8xf32>
    %45 = vector.shape_cast %44 : vector<2x8xf32> to vector<2x8x1xf32>
    %46 = vector.broadcast %45 : vector<2x8x1xf32> to vector<2x8x8xf32>
    %47 = arith.subf %43, %46 : vector<2x8x8xf32>
    %48 = math.exp %47 : vector<2x8x8xf32>
    %cst_22 = arith.constant dense<0.000000e+00> : vector<2x8xf32>
    %49 = vector.multi_reduction <add>, %48, %cst_22 [2] : vector<2x8x8xf32> to vector<2x8xf32>
    %50 = vector.shape_cast %49 : vector<2x8xf32> to vector<2x8x1xf32>
    %51 = tpu.reciprocal %50 {approx = true} : vector<2x8x1xf32> -> vector<2x8x1xf32>
    %52 = vector.broadcast %51 : vector<2x8x1xf32> to vector<2x8x8xf32>
    %53 = arith.mulf %48, %52 : vector<2x8x8xf32>
    %cst_23 = arith.constant dense<0.000000e+00> : vector<2x8x8xf32>
    %54 = tpu.matmul %53, %38, %cst_23 {dimension_numbers = #tpu.dot_dimension_numbers<[2], [1], [1], [2], [0, 0, 0, 1, 1, 2], [0], [0]>} : vector<2x8x8xf32>, vector<2x8x8xf32>, vector<2x8x8xf32> -> vector<2x8x8xf32>
    %55 = vector.shape_cast %54 : vector<2x8x8xf32> to vector<16x8xf32>
    %56 = vector.extract_strided_slice %32 {offsets = [0, 8], sizes = [16, 8], strides = [1, 1]} : vector<16x96xf32> to vector<16x8xf32>
    %57 = vector.shape_cast %56 : vector<16x8xf32> to vector<2x8x8xf32>
    %58 = vector.extract_strided_slice %32 {offsets = [0, 40], sizes = [16, 8], strides = [1, 1]} : vector<16x96xf32> to vector<16x8xf32>
    %59 = vector.shape_cast %58 : vector<16x8xf32> to vector<2x8x8xf32>
    %60 = vector.extract_strided_slice %32 {offsets = [0, 72], sizes = [16, 8], strides = [1, 1]} : vector<16x96xf32> to vector<16x8xf32>
    %61 = vector.shape_cast %60 : vector<16x8xf32> to vector<2x8x8xf32>
    %cst_24 = arith.constant dense<0.000000e+00> : vector<2x8x8xf32>
    %62 = tpu.matmul %57, %59, %cst_24 {dimension_numbers = #tpu.dot_dimension_numbers<[2], [2], [1], [1], [0, 0, 0, 1, 1, 1], [0], [0]>} : vector<2x8x8xf32>, vector<2x8x8xf32>, vector<2x8x8xf32> -> vector<2x8x8xf32>
    %cst_25 = arith.constant 0.353553385 : f32
    %63 = vector.broadcast %cst_25 : f32 to vector<2x8x8xf32>
    %64 = arith.mulf %62, %63 : vector<2x8x8xf32>
    %65 = vector.broadcast %23 : vector<2x1x8xf32> to vector<2x8x8xf32>
    %66 = arith.addf %64, %65 : vector<2x8x8xf32>
    %cst_26 = arith.constant dense<0xFF800000> : vector<2x8xf32>
    %67 = vector.multi_reduction <maximumf>, %66, %cst_26 [2] : vector<2x8x8xf32> to vector<2x8xf32>
    %68 = vector.shape_cast %67 : vector<2x8xf32> to vector<2x8x1xf32>
    %69 = vector.broadcast %68 : vector<2x8x1xf32> to vector<2x8x8xf32>
    %70 = arith.subf %66, %69 : vector<2x8x8xf32>
    %71 = math.exp %70 : vector<2x8x8xf32>
    %cst_27 = arith.constant dense<0.000000e+00> : vector<2x8xf32>
    %72 = vector.multi_reduction <add>, %71, %cst_27 [2] : vector<2x8x8xf32> to vector<2x8xf32>
    %73 = vector.shape_cast %72 : vector<2x8xf32> to vector<2x8x1xf32>
    %74 = tpu.reciprocal %73 {approx = true} : vector<2x8x1xf32> -> vector<2x8x1xf32>
    %75 = vector.broadcast %74 : vector<2x8x1xf32> to vector<2x8x8xf32>
    %76 = arith.mulf %71, %75 : vector<2x8x8xf32>
    %cst_28 = arith.constant dense<0.000000e+00> : vector<2x8x8xf32>
    %77 = tpu.matmul %76, %61, %cst_28 {dimension_numbers = #tpu.dot_dimension_numbers<[2], [1], [1], [2], [0, 0, 0, 1, 1, 2], [0], [0]>} : vector<2x8x8xf32>, vector<2x8x8xf32>, vector<2x8x8xf32> -> vector<2x8x8xf32>
    %78 = vector.shape_cast %77 : vector<2x8x8xf32> to vector<16x8xf32>
    %79 = vector.extract_strided_slice %32 {offsets = [0, 16], sizes = [16, 8], strides = [1, 1]} : vector<16x96xf32> to vector<16x8xf32>
    %80 = vector.shape_cast %79 : vector<16x8xf32> to vector<2x8x8xf32>
    %81 = vector.extract_strided_slice %32 {offsets = [0, 48], sizes = [16, 8], strides = [1, 1]} : vector<16x96xf32> to vector<16x8xf32>
    %82 = vector.shape_cast %81 : vector<16x8xf32> to vector<2x8x8xf32>
    %83 = vector.extract_strided_slice %32 {offsets = [0, 80], sizes = [16, 8], strides = [1, 1]} : vector<16x96xf32> to vector<16x8xf32>
    %84 = vector.shape_cast %83 : vector<16x8xf32> to vector<2x8x8xf32>
    %cst_29 = arith.constant dense<0.000000e+00> : vector<2x8x8xf32>
    %85 = tpu.matmul %80, %82, %cst_29 {dimension_numbers = #tpu.dot_dimension_numbers<[2], [2], [1], [1], [0, 0, 0, 1, 1, 1], [0], [0]>} : vector<2x8x8xf32>, vector<2x8x8xf32>, vector<2x8x8xf32> -> vector<2x8x8xf32>
    %cst_30 = arith.constant 0.353553385 : f32
    %86 = vector.broadcast %cst_30 : f32 to vector<2x8x8xf32>
    %87 = arith.mulf %85, %86 : vector<2x8x8xf32>
    %88 = vector.broadcast %23 : vector<2x1x8xf32> to vector<2x8x8xf32>
    %89 = arith.addf %87, %88 : vector<2x8x8xf32>
    %cst_31 = arith.constant dense<0xFF800000> : vector<2x8xf32>
    %90 = vector.multi_reduction <maximumf>, %89, %cst_31 [2] : vector<2x8x8xf32> to vector<2x8xf32>
    %91 = vector.shape_cast %90 : vector<2x8xf32> to vector<2x8x1xf32>
    %92 = vector.broadcast %91 : vector<2x8x1xf32> to vector<2x8x8xf32>
    %93 = arith.subf %89, %92 : vector<2x8x8xf32>
    %94 = math.exp %93 : vector<2x8x8xf32>
    %cst_32 = arith.constant dense<0.000000e+00> : vector<2x8xf32>
    %95 = vector.multi_reduction <add>, %94, %cst_32 [2] : vector<2x8x8xf32> to vector<2x8xf32>
    %96 = vector.shape_cast %95 : vector<2x8xf32> to vector<2x8x1xf32>
    %97 = tpu.reciprocal %96 {approx = true} : vector<2x8x1xf32> -> vector<2x8x1xf32>
    %98 = vector.broadcast %97 : vector<2x8x1xf32> to vector<2x8x8xf32>
    %99 = arith.mulf %94, %98 : vector<2x8x8xf32>
    %cst_33 = arith.constant dense<0.000000e+00> : vector<2x8x8xf32>
    %100 = tpu.matmul %99, %84, %cst_33 {dimension_numbers = #tpu.dot_dimension_numbers<[2], [1], [1], [2], [0, 0, 0, 1, 1, 2], [0], [0]>} : vector<2x8x8xf32>, vector<2x8x8xf32>, vector<2x8x8xf32> -> vector<2x8x8xf32>
    %101 = vector.shape_cast %100 : vector<2x8x8xf32> to vector<16x8xf32>
    %102 = vector.extract_strided_slice %32 {offsets = [0, 24], sizes = [16, 8], strides = [1, 1]} : vector<16x96xf32> to vector<16x8xf32>
    %103 = vector.shape_cast %102 : vector<16x8xf32> to vector<2x8x8xf32>
    %104 = vector.extract_strided_slice %32 {offsets = [0, 56], sizes = [16, 8], strides = [1, 1]} : vector<16x96xf32> to vector<16x8xf32>
    %105 = vector.shape_cast %104 : vector<16x8xf32> to vector<2x8x8xf32>
    %106 = vector.extract_strided_slice %32 {offsets = [0, 88], sizes = [16, 8], strides = [1, 1]} : vector<16x96xf32> to vector<16x8xf32>
    %107 = vector.shape_cast %106 : vector<16x8xf32> to vector<2x8x8xf32>
    %cst_34 = arith.constant dense<0.000000e+00> : vector<2x8x8xf32>
    %108 = tpu.matmul %103, %105, %cst_34 {dimension_numbers = #tpu.dot_dimension_numbers<[2], [2], [1], [1], [0, 0, 0, 1, 1, 1], [0], [0]>} : vector<2x8x8xf32>, vector<2x8x8xf32>, vector<2x8x8xf32> -> vector<2x8x8xf32>
    %cst_35 = arith.constant 0.353553385 : f32
    %109 = vector.broadcast %cst_35 : f32 to vector<2x8x8xf32>
    %110 = arith.mulf %108, %109 : vector<2x8x8xf32>
    %111 = vector.broadcast %23 : vector<2x1x8xf32> to vector<2x8x8xf32>
    %112 = arith.addf %110, %111 : vector<2x8x8xf32>
    %cst_36 = arith.constant dense<0xFF800000> : vector<2x8xf32>
    %113 = vector.multi_reduction <maximumf>, %112, %cst_36 [2] : vector<2x8x8xf32> to vector<2x8xf32>
    %114 = vector.shape_cast %113 : vector<2x8xf32> to vector<2x8x1xf32>
    %115 = vector.broadcast %114 : vector<2x8x1xf32> to vector<2x8x8xf32>
    %116 = arith.subf %112, %115 : vector<2x8x8xf32>
    %117 = math.exp %116 : vector<2x8x8xf32>
    %cst_37 = arith.constant dense<0.000000e+00> : vector<2x8xf32>
    %118 = vector.multi_reduction <add>, %117, %cst_37 [2] : vector<2x8x8xf32> to vector<2x8xf32>
    %119 = vector.shape_cast %118 : vector<2x8xf32> to vector<2x8x1xf32>
    %120 = tpu.reciprocal %119 {approx = true} : vector<2x8x1xf32> -> vector<2x8x1xf32>
    %121 = vector.broadcast %120 : vector<2x8x1xf32> to vector<2x8x8xf32>
    %122 = arith.mulf %117, %121 : vector<2x8x8xf32>
    %cst_38 = arith.constant dense<0.000000e+00> : vector<2x8x8xf32>
    %123 = tpu.matmul %122, %107, %cst_38 {dimension_numbers = #tpu.dot_dimension_numbers<[2], [1], [1], [2], [0, 0, 0, 1, 1, 2], [0], [0]>} : vector<2x8x8xf32>, vector<2x8x8xf32>, vector<2x8x8xf32> -> vector<2x8x8xf32>
    %124 = vector.shape_cast %123 : vector<2x8x8xf32> to vector<16x8xf32>
    %125 = tpu.concatenate %55, %78, %101, %124 in 1 : vector<16x8xf32>, vector<16x8xf32>, vector<16x8xf32>, vector<16x8xf32> -> vector<16x32xf32>
    %c0_39 = arith.constant 0 : index
    %c0_40 = arith.constant 0 : index
    %c0_41 = arith.constant 0 : index
    %126 = vector.load %arg6[%c0_39, %c0_40, %c0_41] : memref<2x32x32xf32, #tpu.memory_space<vmem>>, vector<1x32x32xf32>
    %127 = vector.shape_cast %126 : vector<1x32x32xf32> to vector<32x32xf32>
    %128 = arith.truncf %125 : vector<16x32xf32> to vector<16x32xbf16>
    %129 = arith.truncf %127 : vector<32x32xf32> to vector<32x32xbf16>
    %cst_42 = arith.constant dense<0.000000e+00> : vector<16x32xf32>
    %130 = tpu.matmul %128, %129, %cst_42 {dimension_numbers = #tpu.dot_dimension_numbers<[1], [0], [0], [1], [0, 0, 1, 1], [], []>} : vector<16x32xbf16>, vector<32x32xbf16>, vector<16x32xf32> -> vector<16x32xf32>
    %c0_43 = arith.constant 0 : index
    %c0_44 = arith.constant 0 : index
    %c0_45 = arith.constant 0 : index
    %131 = vector.load %arg7[%c0_43, %c0_44, %c0_45] : memref<2x1x32xf32, #tpu.memory_space<vmem>>, vector<1x1x32xf32>
    %132 = vector.shape_cast %131 : vector<1x1x32xf32> to vector<1x32xf32>
    %133 = vector.broadcast %132 : vector<1x32xf32> to vector<16x32xf32>
    %134 = arith.addf %130, %133 : vector<16x32xf32>
    %135 = arith.addf %134, %22 : vector<16x32xf32>
    %c0_46 = arith.constant 0 : index
    %c0_47 = arith.constant 0 : index
    %c0_48 = arith.constant 0 : index
    %136 = vector.load %arg8[%c0_46, %c0_47, %c0_48] : memref<2x1x32xf32, #tpu.memory_space<vmem>>, vector<1x1x32xf32>
    %137 = vector.shape_cast %136 : vector<1x1x32xf32> to vector<1x32xf32>
    %c0_49 = arith.constant 0 : index
    %c0_50 = arith.constant 0 : index
    %c0_51 = arith.constant 0 : index
    %138 = vector.load %arg9[%c0_49, %c0_50, %c0_51] : memref<2x1x32xf32, #tpu.memory_space<vmem>>, vector<1x1x32xf32>
    %139 = vector.shape_cast %138 : vector<1x1x32xf32> to vector<1x32xf32>
    %cst_52 = arith.constant dense<0.000000e+00> : vector<16xf32>
    %140 = vector.multi_reduction <add>, %135, %cst_52 [1] : vector<16x32xf32> to vector<16xf32>
    %141 = vector.shape_cast %140 : vector<16xf32> to vector<16x1xf32>
    %cst_53 = arith.constant 3.200000e+01 : f32
    %142 = vector.broadcast %cst_53 : f32 to vector<16x1xf32>
    %143 = arith.divf %141, %142 : vector<16x1xf32>
    %144 = vector.broadcast %143 : vector<16x1xf32> to vector<16x32xf32>
    %145 = arith.subf %135, %144 : vector<16x32xf32>
    %146 = arith.mulf %145, %145 : vector<16x32xf32>
    %cst_54 = arith.constant dense<0.000000e+00> : vector<16xf32>
    %147 = vector.multi_reduction <add>, %146, %cst_54 [1] : vector<16x32xf32> to vector<16xf32>
    %148 = vector.shape_cast %147 : vector<16xf32> to vector<16x1xf32>
    %cst_55 = arith.constant 3.200000e+01 : f32
    %149 = vector.broadcast %cst_55 : f32 to vector<16x1xf32>
    %150 = arith.divf %148, %149 : vector<16x1xf32>
    %cst_56 = arith.constant 9.99999996E-13 : f32
    %151 = vector.broadcast %cst_56 : f32 to vector<16x1xf32>
    %152 = arith.addf %150, %151 : vector<16x1xf32>
    %153 = math.rsqrt %152 : vector<16x1xf32>
    %154 = vector.broadcast %153 : vector<16x1xf32> to vector<16x32xf32>
    %155 = arith.mulf %145, %154 : vector<16x32xf32>
    %156 = vector.broadcast %137 : vector<1x32xf32> to vector<16x32xf32>
    %157 = arith.mulf %155, %156 : vector<16x32xf32>
    %158 = vector.broadcast %139 : vector<1x32xf32> to vector<16x32xf32>
    %159 = arith.addf %157, %158 : vector<16x32xf32>
    %c0_57 = arith.constant 0 : index
    %c0_58 = arith.constant 0 : index
    %c0_59 = arith.constant 0 : index
    %160 = vector.load %arg10[%c0_57, %c0_58, %c0_59] : memref<2x32x64xf32, #tpu.memory_space<vmem>>, vector<1x32x64xf32>
    %161 = vector.shape_cast %160 : vector<1x32x64xf32> to vector<32x64xf32>
    %162 = arith.truncf %159 : vector<16x32xf32> to vector<16x32xbf16>
    %163 = arith.truncf %161 : vector<32x64xf32> to vector<32x64xbf16>
    %cst_60 = arith.constant dense<0.000000e+00> : vector<16x64xf32>
    %164 = tpu.matmul %162, %163, %cst_60 {dimension_numbers = #tpu.dot_dimension_numbers<[1], [0], [0], [1], [0, 0, 1, 1], [], []>} : vector<16x32xbf16>, vector<32x64xbf16>, vector<16x64xf32> -> vector<16x64xf32>
    %c0_61 = arith.constant 0 : index
    %c0_62 = arith.constant 0 : index
    %c0_63 = arith.constant 0 : index
    %165 = vector.load %arg11[%c0_61, %c0_62, %c0_63] : memref<2x1x64xf32, #tpu.memory_space<vmem>>, vector<1x1x64xf32>
    %166 = vector.shape_cast %165 : vector<1x1x64xf32> to vector<1x64xf32>
    %167 = vector.broadcast %166 : vector<1x64xf32> to vector<16x64xf32>
    %168 = arith.addf %164, %167 : vector<16x64xf32>
    %cst_64 = arith.constant 5.000000e-01 : f32
    %169 = vector.broadcast %cst_64 : f32 to vector<16x64xf32>
    %170 = arith.mulf %169, %168 : vector<16x64xf32>
    %cst_65 = arith.constant 0.707106769 : f32
    %171 = vector.broadcast %cst_65 : f32 to vector<16x64xf32>
    %172 = arith.mulf %168, %171 : vector<16x64xf32>
    %173 = math.erf %172 : vector<16x64xf32>
    %cst_66 = arith.constant 1.000000e+00 : f32
    %174 = vector.broadcast %cst_66 : f32 to vector<16x64xf32>
    %175 = arith.addf %174, %173 : vector<16x64xf32>
    %176 = arith.mulf %170, %175 : vector<16x64xf32>
    %c0_67 = arith.constant 0 : index
    %c0_68 = arith.constant 0 : index
    %c0_69 = arith.constant 0 : index
    %177 = vector.load %arg12[%c0_67, %c0_68, %c0_69] : memref<2x64x32xf32, #tpu.memory_space<vmem>>, vector<1x64x32xf32>
    %178 = vector.shape_cast %177 : vector<1x64x32xf32> to vector<64x32xf32>
    %179 = arith.truncf %176 : vector<16x64xf32> to vector<16x64xbf16>
    %180 = arith.truncf %178 : vector<64x32xf32> to vector<64x32xbf16>
    %cst_70 = arith.constant dense<0.000000e+00> : vector<16x32xf32>
    %181 = tpu.matmul %179, %180, %cst_70 {dimension_numbers = #tpu.dot_dimension_numbers<[1], [0], [0], [1], [0, 0, 1, 1], [], []>} : vector<16x64xbf16>, vector<64x32xbf16>, vector<16x32xf32> -> vector<16x32xf32>
    %c0_71 = arith.constant 0 : index
    %c0_72 = arith.constant 0 : index
    %c0_73 = arith.constant 0 : index
    %182 = vector.load %arg13[%c0_71, %c0_72, %c0_73] : memref<2x1x32xf32, #tpu.memory_space<vmem>>, vector<1x1x32xf32>
    %183 = vector.shape_cast %182 : vector<1x1x32xf32> to vector<1x32xf32>
    %184 = vector.broadcast %183 : vector<1x32xf32> to vector<16x32xf32>
    %185 = arith.addf %181, %184 : vector<16x32xf32>
    %186 = arith.addf %185, %159 : vector<16x32xf32>
    %c0_74 = arith.constant 0 : index
    %c0_75 = arith.constant 0 : index
    %c0_76 = arith.constant 0 : index
    %187 = vector.load %arg14[%c0_74, %c0_75, %c0_76] : memref<2x1x32xf32, #tpu.memory_space<vmem>>, vector<1x1x32xf32>
    %188 = vector.shape_cast %187 : vector<1x1x32xf32> to vector<1x32xf32>
    %c0_77 = arith.constant 0 : index
    %c0_78 = arith.constant 0 : index
    %c0_79 = arith.constant 0 : index
    %189 = vector.load %arg15[%c0_77, %c0_78, %c0_79] : memref<2x1x32xf32, #tpu.memory_space<vmem>>, vector<1x1x32xf32>
    %190 = vector.shape_cast %189 : vector<1x1x32xf32> to vector<1x32xf32>
    %cst_80 = arith.constant dense<0.000000e+00> : vector<16xf32>
    %191 = vector.multi_reduction <add>, %186, %cst_80 [1] : vector<16x32xf32> to vector<16xf32>
    %192 = vector.shape_cast %191 : vector<16xf32> to vector<16x1xf32>
    %cst_81 = arith.constant 3.200000e+01 : f32
    %193 = vector.broadcast %cst_81 : f32 to vector<16x1xf32>
    %194 = arith.divf %192, %193 : vector<16x1xf32>
    %195 = vector.broadcast %194 : vector<16x1xf32> to vector<16x32xf32>
    %196 = arith.subf %186, %195 : vector<16x32xf32>
    %197 = arith.mulf %196, %196 : vector<16x32xf32>
    %cst_82 = arith.constant dense<0.000000e+00> : vector<16xf32>
    %198 = vector.multi_reduction <add>, %197, %cst_82 [1] : vector<16x32xf32> to vector<16xf32>
    %199 = vector.shape_cast %198 : vector<16xf32> to vector<16x1xf32>
    %cst_83 = arith.constant 3.200000e+01 : f32
    %200 = vector.broadcast %cst_83 : f32 to vector<16x1xf32>
    %201 = arith.divf %199, %200 : vector<16x1xf32>
    %cst_84 = arith.constant 9.99999996E-13 : f32
    %202 = vector.broadcast %cst_84 : f32 to vector<16x1xf32>
    %203 = arith.addf %201, %202 : vector<16x1xf32>
    %204 = math.rsqrt %203 : vector<16x1xf32>
    %205 = vector.broadcast %204 : vector<16x1xf32> to vector<16x32xf32>
    %206 = arith.mulf %196, %205 : vector<16x32xf32>
    %207 = vector.broadcast %188 : vector<1x32xf32> to vector<16x32xf32>
    %208 = arith.mulf %206, %207 : vector<16x32xf32>
    %209 = vector.broadcast %190 : vector<1x32xf32> to vector<16x32xf32>
    %210 = arith.addf %208, %209 : vector<16x32xf32>
    %c1 = arith.constant 1 : index
    %c0_85 = arith.constant 0 : index
    %c0_86 = arith.constant 0 : index
    %211 = vector.load %arg4[%c1, %c0_85, %c0_86] : memref<2x32x96xf32, #tpu.memory_space<vmem>>, vector<1x32x96xf32>
    %212 = vector.shape_cast %211 : vector<1x32x96xf32> to vector<32x96xf32>
    %213 = arith.truncf %210 : vector<16x32xf32> to vector<16x32xbf16>
    %214 = arith.truncf %212 : vector<32x96xf32> to vector<32x96xbf16>
    %cst_87 = arith.constant dense<0.000000e+00> : vector<16x96xf32>
    %215 = tpu.matmul %213, %214, %cst_87 {dimension_numbers = #tpu.dot_dimension_numbers<[1], [0], [0], [1], [0, 0, 1, 1], [], []>} : vector<16x32xbf16>, vector<32x96xbf16>, vector<16x96xf32> -> vector<16x96xf32>
    %c1_88 = arith.constant 1 : index
    %c0_89 = arith.constant 0 : index
    %c0_90 = arith.constant 0 : index
    %216 = vector.load %arg5[%c1_88, %c0_89, %c0_90] : memref<2x1x96xf32, #tpu.memory_space<vmem>>, vector<1x1x96xf32>
    %217 = vector.shape_cast %216 : vector<1x1x96xf32> to vector<1x96xf32>
    %218 = vector.broadcast %217 : vector<1x96xf32> to vector<16x96xf32>
    %219 = arith.addf %215, %218 : vector<16x96xf32>
    %220 = vector.extract_strided_slice %219 {offsets = [0, 0], sizes = [16, 8], strides = [1, 1]} : vector<16x96xf32> to vector<16x8xf32>
    %221 = vector.shape_cast %220 : vector<16x8xf32> to vector<2x8x8xf32>
    %222 = vector.extract_strided_slice %219 {offsets = [0, 32], sizes = [16, 8], strides = [1, 1]} : vector<16x96xf32> to vector<16x8xf32>
    %223 = vector.shape_cast %222 : vector<16x8xf32> to vector<2x8x8xf32>
    %224 = vector.extract_strided_slice %219 {offsets = [0, 64], sizes = [16, 8], strides = [1, 1]} : vector<16x96xf32> to vector<16x8xf32>
    %225 = vector.shape_cast %224 : vector<16x8xf32> to vector<2x8x8xf32>
    %cst_91 = arith.constant dense<0.000000e+00> : vector<2x8x8xf32>
    %226 = tpu.matmul %221, %223, %cst_91 {dimension_numbers = #tpu.dot_dimension_numbers<[2], [2], [1], [1], [0, 0, 0, 1, 1, 1], [0], [0]>} : vector<2x8x8xf32>, vector<2x8x8xf32>, vector<2x8x8xf32> -> vector<2x8x8xf32>
    %cst_92 = arith.constant 0.353553385 : f32
    %227 = vector.broadcast %cst_92 : f32 to vector<2x8x8xf32>
    %228 = arith.mulf %226, %227 : vector<2x8x8xf32>
    %229 = vector.broadcast %23 : vector<2x1x8xf32> to vector<2x8x8xf32>
    %230 = arith.addf %228, %229 : vector<2x8x8xf32>
    %cst_93 = arith.constant dense<0xFF800000> : vector<2x8xf32>
    %231 = vector.multi_reduction <maximumf>, %230, %cst_93 [2] : vector<2x8x8xf32> to vector<2x8xf32>
    %232 = vector.shape_cast %231 : vector<2x8xf32> to vector<2x8x1xf32>
    %233 = vector.broadcast %232 : vector<2x8x1xf32> to vector<2x8x8xf32>
    %234 = arith.subf %230, %233 : vector<2x8x8xf32>
    %235 = math.exp %234 : vector<2x8x8xf32>
    %cst_94 = arith.constant dense<0.000000e+00> : vector<2x8xf32>
    %236 = vector.multi_reduction <add>, %235, %cst_94 [2] : vector<2x8x8xf32> to vector<2x8xf32>
    %237 = vector.shape_cast %236 : vector<2x8xf32> to vector<2x8x1xf32>
    %238 = tpu.reciprocal %237 {approx = true} : vector<2x8x1xf32> -> vector<2x8x1xf32>
    %239 = vector.broadcast %238 : vector<2x8x1xf32> to vector<2x8x8xf32>
    %240 = arith.mulf %235, %239 : vector<2x8x8xf32>
    %cst_95 = arith.constant dense<0.000000e+00> : vector<2x8x8xf32>
    %241 = tpu.matmul %240, %225, %cst_95 {dimension_numbers = #tpu.dot_dimension_numbers<[2], [1], [1], [2], [0, 0, 0, 1, 1, 2], [0], [0]>} : vector<2x8x8xf32>, vector<2x8x8xf32>, vector<2x8x8xf32> -> vector<2x8x8xf32>
    %242 = vector.shape_cast %241 : vector<2x8x8xf32> to vector<16x8xf32>
    %243 = vector.extract_strided_slice %219 {offsets = [0, 8], sizes = [16, 8], strides = [1, 1]} : vector<16x96xf32> to vector<16x8xf32>
    %244 = vector.shape_cast %243 : vector<16x8xf32> to vector<2x8x8xf32>
    %245 = vector.extract_strided_slice %219 {offsets = [0, 40], sizes = [16, 8], strides = [1, 1]} : vector<16x96xf32> to vector<16x8xf32>
    %246 = vector.shape_cast %245 : vector<16x8xf32> to vector<2x8x8xf32>
    %247 = vector.extract_strided_slice %219 {offsets = [0, 72], sizes = [16, 8], strides = [1, 1]} : vector<16x96xf32> to vector<16x8xf32>
    %248 = vector.shape_cast %247 : vector<16x8xf32> to vector<2x8x8xf32>
    %cst_96 = arith.constant dense<0.000000e+00> : vector<2x8x8xf32>
    %249 = tpu.matmul %244, %246, %cst_96 {dimension_numbers = #tpu.dot_dimension_numbers<[2], [2], [1], [1], [0, 0, 0, 1, 1, 1], [0], [0]>} : vector<2x8x8xf32>, vector<2x8x8xf32>, vector<2x8x8xf32> -> vector<2x8x8xf32>
    %cst_97 = arith.constant 0.353553385 : f32
    %250 = vector.broadcast %cst_97 : f32 to vector<2x8x8xf32>
    %251 = arith.mulf %249, %250 : vector<2x8x8xf32>
    %252 = vector.broadcast %23 : vector<2x1x8xf32> to vector<2x8x8xf32>
    %253 = arith.addf %251, %252 : vector<2x8x8xf32>
    %cst_98 = arith.constant dense<0xFF800000> : vector<2x8xf32>
    %254 = vector.multi_reduction <maximumf>, %253, %cst_98 [2] : vector<2x8x8xf32> to vector<2x8xf32>
    %255 = vector.shape_cast %254 : vector<2x8xf32> to vector<2x8x1xf32>
    %256 = vector.broadcast %255 : vector<2x8x1xf32> to vector<2x8x8xf32>
    %257 = arith.subf %253, %256 : vector<2x8x8xf32>
    %258 = math.exp %257 : vector<2x8x8xf32>
    %cst_99 = arith.constant dense<0.000000e+00> : vector<2x8xf32>
    %259 = vector.multi_reduction <add>, %258, %cst_99 [2] : vector<2x8x8xf32> to vector<2x8xf32>
    %260 = vector.shape_cast %259 : vector<2x8xf32> to vector<2x8x1xf32>
    %261 = tpu.reciprocal %260 {approx = true} : vector<2x8x1xf32> -> vector<2x8x1xf32>
    %262 = vector.broadcast %261 : vector<2x8x1xf32> to vector<2x8x8xf32>
    %263 = arith.mulf %258, %262 : vector<2x8x8xf32>
    %cst_100 = arith.constant dense<0.000000e+00> : vector<2x8x8xf32>
    %264 = tpu.matmul %263, %248, %cst_100 {dimension_numbers = #tpu.dot_dimension_numbers<[2], [1], [1], [2], [0, 0, 0, 1, 1, 2], [0], [0]>} : vector<2x8x8xf32>, vector<2x8x8xf32>, vector<2x8x8xf32> -> vector<2x8x8xf32>
    %265 = vector.shape_cast %264 : vector<2x8x8xf32> to vector<16x8xf32>
    %266 = vector.extract_strided_slice %219 {offsets = [0, 16], sizes = [16, 8], strides = [1, 1]} : vector<16x96xf32> to vector<16x8xf32>
    %267 = vector.shape_cast %266 : vector<16x8xf32> to vector<2x8x8xf32>
    %268 = vector.extract_strided_slice %219 {offsets = [0, 48], sizes = [16, 8], strides = [1, 1]} : vector<16x96xf32> to vector<16x8xf32>
    %269 = vector.shape_cast %268 : vector<16x8xf32> to vector<2x8x8xf32>
    %270 = vector.extract_strided_slice %219 {offsets = [0, 80], sizes = [16, 8], strides = [1, 1]} : vector<16x96xf32> to vector<16x8xf32>
    %271 = vector.shape_cast %270 : vector<16x8xf32> to vector<2x8x8xf32>
    %cst_101 = arith.constant dense<0.000000e+00> : vector<2x8x8xf32>
    %272 = tpu.matmul %267, %269, %cst_101 {dimension_numbers = #tpu.dot_dimension_numbers<[2], [2], [1], [1], [0, 0, 0, 1, 1, 1], [0], [0]>} : vector<2x8x8xf32>, vector<2x8x8xf32>, vector<2x8x8xf32> -> vector<2x8x8xf32>
    %cst_102 = arith.constant 0.353553385 : f32
    %273 = vector.broadcast %cst_102 : f32 to vector<2x8x8xf32>
    %274 = arith.mulf %272, %273 : vector<2x8x8xf32>
    %275 = vector.broadcast %23 : vector<2x1x8xf32> to vector<2x8x8xf32>
    %276 = arith.addf %274, %275 : vector<2x8x8xf32>
    %cst_103 = arith.constant dense<0xFF800000> : vector<2x8xf32>
    %277 = vector.multi_reduction <maximumf>, %276, %cst_103 [2] : vector<2x8x8xf32> to vector<2x8xf32>
    %278 = vector.shape_cast %277 : vector<2x8xf32> to vector<2x8x1xf32>
    %279 = vector.broadcast %278 : vector<2x8x1xf32> to vector<2x8x8xf32>
    %280 = arith.subf %276, %279 : vector<2x8x8xf32>
    %281 = math.exp %280 : vector<2x8x8xf32>
    %cst_104 = arith.constant dense<0.000000e+00> : vector<2x8xf32>
    %282 = vector.multi_reduction <add>, %281, %cst_104 [2] : vector<2x8x8xf32> to vector<2x8xf32>
    %283 = vector.shape_cast %282 : vector<2x8xf32> to vector<2x8x1xf32>
    %284 = tpu.reciprocal %283 {approx = true} : vector<2x8x1xf32> -> vector<2x8x1xf32>
    %285 = vector.broadcast %284 : vector<2x8x1xf32> to vector<2x8x8xf32>
    %286 = arith.mulf %281, %285 : vector<2x8x8xf32>
    %cst_105 = arith.constant dense<0.000000e+00> : vector<2x8x8xf32>
    %287 = tpu.matmul %286, %271, %cst_105 {dimension_numbers = #tpu.dot_dimension_numbers<[2], [1], [1], [2], [0, 0, 0, 1, 1, 2], [0], [0]>} : vector<2x8x8xf32>, vector<2x8x8xf32>, vector<2x8x8xf32> -> vector<2x8x8xf32>
    %288 = vector.shape_cast %287 : vector<2x8x8xf32> to vector<16x8xf32>
    %289 = vector.extract_strided_slice %219 {offsets = [0, 24], sizes = [16, 8], strides = [1, 1]} : vector<16x96xf32> to vector<16x8xf32>
    %290 = vector.shape_cast %289 : vector<16x8xf32> to vector<2x8x8xf32>
    %291 = vector.extract_strided_slice %219 {offsets = [0, 56], sizes = [16, 8], strides = [1, 1]} : vector<16x96xf32> to vector<16x8xf32>
    %292 = vector.shape_cast %291 : vector<16x8xf32> to vector<2x8x8xf32>
    %293 = vector.extract_strided_slice %219 {offsets = [0, 88], sizes = [16, 8], strides = [1, 1]} : vector<16x96xf32> to vector<16x8xf32>
    %294 = vector.shape_cast %293 : vector<16x8xf32> to vector<2x8x8xf32>
    %cst_106 = arith.constant dense<0.000000e+00> : vector<2x8x8xf32>
    %295 = tpu.matmul %290, %292, %cst_106 {dimension_numbers = #tpu.dot_dimension_numbers<[2], [2], [1], [1], [0, 0, 0, 1, 1, 1], [0], [0]>} : vector<2x8x8xf32>, vector<2x8x8xf32>, vector<2x8x8xf32> -> vector<2x8x8xf32>
    %cst_107 = arith.constant 0.353553385 : f32
    %296 = vector.broadcast %cst_107 : f32 to vector<2x8x8xf32>
    %297 = arith.mulf %295, %296 : vector<2x8x8xf32>
    %298 = vector.broadcast %23 : vector<2x1x8xf32> to vector<2x8x8xf32>
    %299 = arith.addf %297, %298 : vector<2x8x8xf32>
    %cst_108 = arith.constant dense<0xFF800000> : vector<2x8xf32>
    %300 = vector.multi_reduction <maximumf>, %299, %cst_108 [2] : vector<2x8x8xf32> to vector<2x8xf32>
    %301 = vector.shape_cast %300 : vector<2x8xf32> to vector<2x8x1xf32>
    %302 = vector.broadcast %301 : vector<2x8x1xf32> to vector<2x8x8xf32>
    %303 = arith.subf %299, %302 : vector<2x8x8xf32>
    %304 = math.exp %303 : vector<2x8x8xf32>
    %cst_109 = arith.constant dense<0.000000e+00> : vector<2x8xf32>
    %305 = vector.multi_reduction <add>, %304, %cst_109 [2] : vector<2x8x8xf32> to vector<2x8xf32>
    %306 = vector.shape_cast %305 : vector<2x8xf32> to vector<2x8x1xf32>
    %307 = tpu.reciprocal %306 {approx = true} : vector<2x8x1xf32> -> vector<2x8x1xf32>
    %308 = vector.broadcast %307 : vector<2x8x1xf32> to vector<2x8x8xf32>
    %309 = arith.mulf %304, %308 : vector<2x8x8xf32>
    %cst_110 = arith.constant dense<0.000000e+00> : vector<2x8x8xf32>
    %310 = tpu.matmul %309, %294, %cst_110 {dimension_numbers = #tpu.dot_dimension_numbers<[2], [1], [1], [2], [0, 0, 0, 1, 1, 2], [0], [0]>} : vector<2x8x8xf32>, vector<2x8x8xf32>, vector<2x8x8xf32> -> vector<2x8x8xf32>
    %311 = vector.shape_cast %310 : vector<2x8x8xf32> to vector<16x8xf32>
    %312 = tpu.concatenate %242, %265, %288, %311 in 1 : vector<16x8xf32>, vector<16x8xf32>, vector<16x8xf32>, vector<16x8xf32> -> vector<16x32xf32>
    %c1_111 = arith.constant 1 : index
    %c0_112 = arith.constant 0 : index
    %c0_113 = arith.constant 0 : index
    %313 = vector.load %arg6[%c1_111, %c0_112, %c0_113] : memref<2x32x32xf32, #tpu.memory_space<vmem>>, vector<1x32x32xf32>
    %314 = vector.shape_cast %313 : vector<1x32x32xf32> to vector<32x32xf32>
    %315 = arith.truncf %312 : vector<16x32xf32> to vector<16x32xbf16>
    %316 = arith.truncf %314 : vector<32x32xf32> to vector<32x32xbf16>
    %cst_114 = arith.constant dense<0.000000e+00> : vector<16x32xf32>
    %317 = tpu.matmul %315, %316, %cst_114 {dimension_numbers = #tpu.dot_dimension_numbers<[1], [0], [0], [1], [0, 0, 1, 1], [], []>} : vector<16x32xbf16>, vector<32x32xbf16>, vector<16x32xf32> -> vector<16x32xf32>
    %c1_115 = arith.constant 1 : index
    %c0_116 = arith.constant 0 : index
    %c0_117 = arith.constant 0 : index
    %318 = vector.load %arg7[%c1_115, %c0_116, %c0_117] : memref<2x1x32xf32, #tpu.memory_space<vmem>>, vector<1x1x32xf32>
    %319 = vector.shape_cast %318 : vector<1x1x32xf32> to vector<1x32xf32>
    %320 = vector.broadcast %319 : vector<1x32xf32> to vector<16x32xf32>
    %321 = arith.addf %317, %320 : vector<16x32xf32>
    %322 = arith.addf %321, %210 : vector<16x32xf32>
    %c1_118 = arith.constant 1 : index
    %c0_119 = arith.constant 0 : index
    %c0_120 = arith.constant 0 : index
    %323 = vector.load %arg8[%c1_118, %c0_119, %c0_120] : memref<2x1x32xf32, #tpu.memory_space<vmem>>, vector<1x1x32xf32>
    %324 = vector.shape_cast %323 : vector<1x1x32xf32> to vector<1x32xf32>
    %c1_121 = arith.constant 1 : index
    %c0_122 = arith.constant 0 : index
    %c0_123 = arith.constant 0 : index
    %325 = vector.load %arg9[%c1_121, %c0_122, %c0_123] : memref<2x1x32xf32, #tpu.memory_space<vmem>>, vector<1x1x32xf32>
    %326 = vector.shape_cast %325 : vector<1x1x32xf32> to vector<1x32xf32>
    %cst_124 = arith.constant dense<0.000000e+00> : vector<16xf32>
    %327 = vector.multi_reduction <add>, %322, %cst_124 [1] : vector<16x32xf32> to vector<16xf32>
    %328 = vector.shape_cast %327 : vector<16xf32> to vector<16x1xf32>
    %cst_125 = arith.constant 3.200000e+01 : f32
    %329 = vector.broadcast %cst_125 : f32 to vector<16x1xf32>
    %330 = arith.divf %328, %329 : vector<16x1xf32>
    %331 = vector.broadcast %330 : vector<16x1xf32> to vector<16x32xf32>
    %332 = arith.subf %322, %331 : vector<16x32xf32>
    %333 = arith.mulf %332, %332 : vector<16x32xf32>
    %cst_126 = arith.constant dense<0.000000e+00> : vector<16xf32>
    %334 = vector.multi_reduction <add>, %333, %cst_126 [1] : vector<16x32xf32> to vector<16xf32>
    %335 = vector.shape_cast %334 : vector<16xf32> to vector<16x1xf32>
    %cst_127 = arith.constant 3.200000e+01 : f32
    %336 = vector.broadcast %cst_127 : f32 to vector<16x1xf32>
    %337 = arith.divf %335, %336 : vector<16x1xf32>
    %cst_128 = arith.constant 9.99999996E-13 : f32
    %338 = vector.broadcast %cst_128 : f32 to vector<16x1xf32>
    %339 = arith.addf %337, %338 : vector<16x1xf32>
    %340 = math.rsqrt %339 : vector<16x1xf32>
    %341 = vector.broadcast %340 : vector<16x1xf32> to vector<16x32xf32>
    %342 = arith.mulf %332, %341 : vector<16x32xf32>
    %343 = vector.broadcast %324 : vector<1x32xf32> to vector<16x32xf32>
    %344 = arith.mulf %342, %343 : vector<16x32xf32>
    %345 = vector.broadcast %326 : vector<1x32xf32> to vector<16x32xf32>
    %346 = arith.addf %344, %345 : vector<16x32xf32>
    %c1_129 = arith.constant 1 : index
    %c0_130 = arith.constant 0 : index
    %c0_131 = arith.constant 0 : index
    %347 = vector.load %arg10[%c1_129, %c0_130, %c0_131] : memref<2x32x64xf32, #tpu.memory_space<vmem>>, vector<1x32x64xf32>
    %348 = vector.shape_cast %347 : vector<1x32x64xf32> to vector<32x64xf32>
    %349 = arith.truncf %346 : vector<16x32xf32> to vector<16x32xbf16>
    %350 = arith.truncf %348 : vector<32x64xf32> to vector<32x64xbf16>
    %cst_132 = arith.constant dense<0.000000e+00> : vector<16x64xf32>
    %351 = tpu.matmul %349, %350, %cst_132 {dimension_numbers = #tpu.dot_dimension_numbers<[1], [0], [0], [1], [0, 0, 1, 1], [], []>} : vector<16x32xbf16>, vector<32x64xbf16>, vector<16x64xf32> -> vector<16x64xf32>
    %c1_133 = arith.constant 1 : index
    %c0_134 = arith.constant 0 : index
    %c0_135 = arith.constant 0 : index
    %352 = vector.load %arg11[%c1_133, %c0_134, %c0_135] : memref<2x1x64xf32, #tpu.memory_space<vmem>>, vector<1x1x64xf32>
    %353 = vector.shape_cast %352 : vector<1x1x64xf32> to vector<1x64xf32>
    %354 = vector.broadcast %353 : vector<1x64xf32> to vector<16x64xf32>
    %355 = arith.addf %351, %354 : vector<16x64xf32>
    %cst_136 = arith.constant 5.000000e-01 : f32
    %356 = vector.broadcast %cst_136 : f32 to vector<16x64xf32>
    %357 = arith.mulf %356, %355 : vector<16x64xf32>
    %cst_137 = arith.constant 0.707106769 : f32
    %358 = vector.broadcast %cst_137 : f32 to vector<16x64xf32>
    %359 = arith.mulf %355, %358 : vector<16x64xf32>
    %360 = math.erf %359 : vector<16x64xf32>
    %cst_138 = arith.constant 1.000000e+00 : f32
    %361 = vector.broadcast %cst_138 : f32 to vector<16x64xf32>
    %362 = arith.addf %361, %360 : vector<16x64xf32>
    %363 = arith.mulf %357, %362 : vector<16x64xf32>
    %c1_139 = arith.constant 1 : index
    %c0_140 = arith.constant 0 : index
    %c0_141 = arith.constant 0 : index
    %364 = vector.load %arg12[%c1_139, %c0_140, %c0_141] : memref<2x64x32xf32, #tpu.memory_space<vmem>>, vector<1x64x32xf32>
    %365 = vector.shape_cast %364 : vector<1x64x32xf32> to vector<64x32xf32>
    %366 = arith.truncf %363 : vector<16x64xf32> to vector<16x64xbf16>
    %367 = arith.truncf %365 : vector<64x32xf32> to vector<64x32xbf16>
    %cst_142 = arith.constant dense<0.000000e+00> : vector<16x32xf32>
    %368 = tpu.matmul %366, %367, %cst_142 {dimension_numbers = #tpu.dot_dimension_numbers<[1], [0], [0], [1], [0, 0, 1, 1], [], []>} : vector<16x64xbf16>, vector<64x32xbf16>, vector<16x32xf32> -> vector<16x32xf32>
    %c1_143 = arith.constant 1 : index
    %c0_144 = arith.constant 0 : index
    %c0_145 = arith.constant 0 : index
    %369 = vector.load %arg13[%c1_143, %c0_144, %c0_145] : memref<2x1x32xf32, #tpu.memory_space<vmem>>, vector<1x1x32xf32>
    %370 = vector.shape_cast %369 : vector<1x1x32xf32> to vector<1x32xf32>
    %371 = vector.broadcast %370 : vector<1x32xf32> to vector<16x32xf32>
    %372 = arith.addf %368, %371 : vector<16x32xf32>
    %373 = arith.addf %372, %346 : vector<16x32xf32>
    %c1_146 = arith.constant 1 : index
    %c0_147 = arith.constant 0 : index
    %c0_148 = arith.constant 0 : index
    %374 = vector.load %arg14[%c1_146, %c0_147, %c0_148] : memref<2x1x32xf32, #tpu.memory_space<vmem>>, vector<1x1x32xf32>
    %375 = vector.shape_cast %374 : vector<1x1x32xf32> to vector<1x32xf32>
    %c1_149 = arith.constant 1 : index
    %c0_150 = arith.constant 0 : index
    %c0_151 = arith.constant 0 : index
    %376 = vector.load %arg15[%c1_149, %c0_150, %c0_151] : memref<2x1x32xf32, #tpu.memory_space<vmem>>, vector<1x1x32xf32>
    %377 = vector.shape_cast %376 : vector<1x1x32xf32> to vector<1x32xf32>
    %cst_152 = arith.constant dense<0.000000e+00> : vector<16xf32>
    %378 = vector.multi_reduction <add>, %373, %cst_152 [1] : vector<16x32xf32> to vector<16xf32>
    %379 = vector.shape_cast %378 : vector<16xf32> to vector<16x1xf32>
    %cst_153 = arith.constant 3.200000e+01 : f32
    %380 = vector.broadcast %cst_153 : f32 to vector<16x1xf32>
    %381 = arith.divf %379, %380 : vector<16x1xf32>
    %382 = vector.broadcast %381 : vector<16x1xf32> to vector<16x32xf32>
    %383 = arith.subf %373, %382 : vector<16x32xf32>
    %384 = arith.mulf %383, %383 : vector<16x32xf32>
    %cst_154 = arith.constant dense<0.000000e+00> : vector<16xf32>
    %385 = vector.multi_reduction <add>, %384, %cst_154 [1] : vector<16x32xf32> to vector<16xf32>
    %386 = vector.shape_cast %385 : vector<16xf32> to vector<16x1xf32>
    %cst_155 = arith.constant 3.200000e+01 : f32
    %387 = vector.broadcast %cst_155 : f32 to vector<16x1xf32>
    %388 = arith.divf %386, %387 : vector<16x1xf32>
    %cst_156 = arith.constant 9.99999996E-13 : f32
    %389 = vector.broadcast %cst_156 : f32 to vector<16x1xf32>
    %390 = arith.addf %388, %389 : vector<16x1xf32>
    %391 = math.rsqrt %390 : vector<16x1xf32>
    %392 = vector.broadcast %391 : vector<16x1xf32> to vector<16x32xf32>
    %393 = arith.mulf %383, %392 : vector<16x32xf32>
    %394 = vector.broadcast %375 : vector<1x32xf32> to vector<16x32xf32>
    %395 = arith.mulf %393, %394 : vector<16x32xf32>
    %396 = vector.broadcast %377 : vector<1x32xf32> to vector<16x32xf32>
    %397 = arith.addf %395, %396 : vector<16x32xf32>
    %c0_157 = arith.constant 0 : index
    %c0_158 = arith.constant 0 : index
    %398 = vector.load %arg18[%c0_157, %c0_158] : memref<16x32xf32, #tpu.memory_space<vmem>>, vector<16x32xf32>
    tpu.vector_store %arg18[%c0_157, %c0_158], %397 {strides = array<i32>} : memref<16x32xf32, #tpu.memory_space<vmem>>, vector<16x32xf32>,
    %399 = vector.extract_strided_slice %397 {offsets = [0, 0], sizes = [1, 32], strides = [1, 1]} : vector<16x32xf32> to vector<1x32xf32>
    %400 = vector.extract_strided_slice %397 {offsets = [8, 0], sizes = [1, 32], strides = [1, 1]} : vector<16x32xf32> to vector<1x32xf32>
    %401 = tpu.concatenate %399, %400 in 0 : vector<1x32xf32>, vector<1x32xf32> -> vector<2x32xf32>
    %c0_159 = arith.constant 0 : index
    %c0_160 = arith.constant 0 : index
    %402 = vector.load %arg16[%c0_159, %c0_160] : memref<32x32xf32, #tpu.memory_space<vmem>>, vector<32x32xf32>
    %403 = arith.truncf %401 : vector<2x32xf32> to vector<2x32xbf16>
    %404 = arith.truncf %402 : vector<32x32xf32> to vector<32x32xbf16>
    %cst_161 = arith.constant dense<0.000000e+00> : vector<2x32xf32>
    %405 = tpu.matmul %403, %404, %cst_161 {dimension_numbers = #tpu.dot_dimension_numbers<[1], [0], [0], [1], [0, 0, 1, 1], [], []>} : vector<2x32xbf16>, vector<32x32xbf16>, vector<2x32xf32> -> vector<2x32xf32>
    %c0_162 = arith.constant 0 : index
    %c0_163 = arith.constant 0 : index
    %406 = vector.load %arg17[%c0_162, %c0_163] : memref<1x32xf32, #tpu.memory_space<vmem>>, vector<1x32xf32>
    %407 = vector.broadcast %406 : vector<1x32xf32> to vector<2x32xf32>
    %408 = arith.addf %405, %407 : vector<2x32xf32>
    %409 = math.tanh %408 : vector<2x32xf32>
    %c0_164 = arith.constant 0 : index
    %c0_165 = arith.constant 0 : index
    %410 = vector.load %arg19[%c0_164, %c0_165] : memref<2x32xf32, #tpu.memory_space<vmem>>, vector<2x32xf32>
    tpu.vector_store %arg19[%c0_164, %c0_165], %409 {strides = array<i32>} : memref<2x32xf32, #tpu.memory_space<vmem>>, vector<2x32xf32>,
    return
  }
}

</mosaic_0001>

<bundles_post_ra>
// kernel: bert_encoder_forward.1
= control target key start
LH: loop header
LB: loop body
LE: loop exit
PB: predicated region body
PF: predicated region fallthrough
CT: control target
= control target key end

     0   :  { %vm66_vm0 = vcmask 261120   ;;  %v4206_v14 = vmov 0.0   ;;  %vm4207_vm1 = vmmov 0   ;;  %s4208_s24 = smov 96   ;;  %vm173_vm2 = vcmask 64512   ;;  %s4209_s28 = smov 64   ;;  %s4973_s0 = inlined_call_operand.vmem [shape: f32[16,32], index: 0, kind: input, shape index: {}]   ;;  %s4974_s4 = inlined_call_operand.vmem [shape: f32[2,32,96], index: 4, kind: input, shape index: {}]   ;;  %s4975_s2 = inlined_call_operand.vmem [shape: f32[1,32], index: 2, kind: input, shape index: {}]   ;;  %s4976_s3 = inlined_call_operand.vmem [shape: f32[1,32], index: 3, kind: input, shape index: {}]   ;;  %s4977_s5 = inlined_call_operand.vmem [shape: f32[2,1,96], index: 5, kind: input, shape index: {}]   ;;  %s4978_s1 = inlined_call_operand.vmem [shape: f32[2,1,8], index: 1, kind: input, shape index: {}]   ;;  %s4979_s6 = inlined_call_operand.vmem [shape: f32[2,32,32], index: 6, kind: input, shape index: {}]   ;;  %s4980_s7 = inlined_call_operand.vmem [shape: f32[2,1,32], index: 7, kind: input, shape index: {}]   ;;  %s4981_s10 = inlined_call_operand.vmem [shape: f32[2,32,64], index: 10, kind: input, shape index: {}]   ;;  %s4982_s8 = inlined_call_operand.vmem [shape: f32[2,1,32], index: 8, kind: input, shape index: {}]   ;;  %s4983_s9 = inlined_call_operand.vmem [shape: f32[2,1,32], index: 9, kind: input, shape index: {}]   ;;  %s4984_s12 = inlined_call_operand.vmem [shape: f32[2,64,32], index: 12, kind: input, shape index: {}]   ;;  %s4985_s11 = inlined_call_operand.vmem [shape: f32[2,1,64], index: 11, kind: input, shape index: {}]   ;;  %s4986_s13 = inlined_call_operand.vmem [shape: f32[2,1,32], index: 13, kind: input, shape index: {}]   ;;  %s4987_s14 = inlined_call_operand.vmem [shape: f32[2,1,32], index: 14, kind: input, shape index: {}]   ;;  %s4988_s15 = inlined_call_operand.vmem [shape: f32[2,1,32], index: 15, kind: input, shape index: {}]   ;;  %s4989_s16 = inlined_call_operand.vmem [shape: f32[32,32], index: 16, kind: input, shape index: {}]   ;;  %s4990_s18 = inlined_call_operand.vmem [shape: f32[16,32], index: 18, kind: output, shape index: {0}]   ;;  %s4991_s17 = inlined_call_operand.vmem [shape: f32[1,32], index: 17, kind: input, shape index: {}]   ;;  %s4992_s19 = inlined_call_operand.vmem [shape: f32[2,32], index: 19, kind: output, shape index: {1}]  }
   0x1   :  { %5008 = sst [smem:[#allocation2_spill]] %s4973_s0  ;;  %3824 = vmatprep.subr.bf16.mxu0 %v4206_v14  ;;  %3828 = vmatprep.mubr.msk.bf16.mxu0 %vm4207_vm1, %v4206_v14  ;;  %v3625_v38 = vld [vmem:[%s4977_s5] ss:$0 sm:$0xff]  ;;  %v4399_v53 = vld [vmem:[%s4978_s1 + $0x1] ss:$0 sm:$0xff]  ;;  %s4210_s29 = smov 88  }
   0x2   :  { %5009 = sst [smem:[#allocation3_spill]] %s4974_s4  ;;  %s5012_s20 = sld [smem:[#allocation2_spill]]  ;;  %3832 = vmatprep.subr.mxu1 %v4206_v14  ;;  %3834 = vmatprep.mubr.msk.f32.mxu1 %vm4207_vm1, %v4206_v14  ;;  %v4393_v48 = vld [vmem:[%s4978_s1] ss:$0 sm:$0xff]  ;;  %vm1543_vm3 = vcmask 130048   ;;  %vm1546_vm4 = vcmask 195584  }
   0x3   :  { %5010 = sst [smem:[#allocation4_spill]] %s4975_s2  ;;  %s5013_s23 = sld [smem:[#allocation3_spill]]  ;;  %vm1741_vm5 = vcmask 523264   ;;  %vm3553_vm6 = vcmask 1040384   ;;  %vm3613_vm7 = vcmask 254976  }
   0x4   :  { %5011 = sst [smem:[#allocation5_spill]] %s4976_s3  ;;  %s5014_s30 = sld [smem:[#allocation4_spill]] }
   0x5   :  { %s5015_s4 = sld [smem:[#allocation5_spill]]  ;;  %s4211_s0 = smov 120  }
   0x6   :  { %s5005_s21 = smov 112   ;;  %s5001_s22 = smov 72  }
   0x7   :  { %s4999_s2 = smov 104   ;;  %s4997_s25 = smov 40  }
   0x8   :  { %v62_v0 = vld [vmem:[%s5012_s20] sm:$0xff]  ;;  %v63_v1 = vld [vmem:[%s5012_s20 + $0x8] sm:$0xff]  ;;  %s4213_s20 = smov 80   ;;  %s4996_s3 = smov 8  }
   0x9   :  { %v67_v2 = vsel %vm66_vm0, %v62_v0, 0.0  ;;  %v70_v3 = vsel %vm66_vm0, %v63_v1, 0.0  ;;  %v112_v15 = vld [vmem:[%s5013_s23] sm:$0xff]  ;;  %v113_v16 = vld [vmem:[%s5013_s23 + $0x8] sm:$0xff]  ;;  %v114_v17 = vld [vmem:[%s5013_s23 + $0x10] sm:$0xff]  ;;  %s4995_s26 = smov 16  }
   0xa   :  { %68 = vadd.xlane.f32.xlu0 %v67_v2  ;;  %v117_v18 = vpack.c.bf16 %v113_v16, %v112_v15  ;;  %v115_v19 = vld [vmem:[%s5013_s23 + $0x18] sm:$0xff]  ;;  %v3623_v29 = vld [vmem:[%s5014_s30] ss:$0 sm:$0xff]  ;;  %s4212_s30 = smov 56   ;;  %s5020_s27 = smov 40  }
   0xb   :  { %v118_v20 = vpack.c.bf16 %v115_v19, %v114_v17  ;;  %v3624_v33 = vld [vmem:[%s5015_s4] ss:$0 sm:$0xff]  ;;  %s5003_s4 = smov 48  }
   0xc   :  { %3825 = vmatpush3.bf16.msra.mxu0 %v117_v18 }
   0xd   :  { %3826 = vmatprep.subr.bf16.mxu0 %v4206_v14 }
   0xe   :  { %71 = vadd.xlane.f32.xlu0 %v70_v3 }
  0x10   :  { %3827 = vmatpush3.bf16.msra.mxu0 %v118_v20 }
  0x11   :  { %3847 = vmatprep.subr.mxu0 %v4206_v14 }
  0x97   :  { %v69_v4 = vpop.xlane.xlu0 %68 }
  0x98   :  { %v74_v5 = vmul.f32 0.03125, %v69_v4 }
  0x9a   :  { %v76_v6 = vsub.f32 %v62_v0, %v74_v5 }
  0x9b   :  { %v72_v7 = vpop.xlane.xlu0 %71 }
  0x9c   :  { %v75_v8 = vmul.f32 0.03125, %v72_v7  ;;  %v78_v9 = vmul.f32 %v76_v6, %v76_v6 }
  0x9e   :  { %v77_v10 = vsub.f32 %v63_v1, %v75_v8  ;;  %v80_v11 = vsel %vm66_vm0, %v78_v9, 0.0 }
  0x9f   :  { %81 = vadd.xlane.f32.xlu1 %v80_v11 }
  0xa0   :  { %v79_v12 = vmul.f32 %v77_v10, %v77_v10 }
  0xa2   :  { %v83_v13 = vsel %vm66_vm0, %v79_v12, 0.0 }
  0xa3   :  { %84 = vadd.xlane.f32.xlu1 %v83_v13 }
 0x12c   :  { %v82_v21 = vpop.xlane.xlu1 %81 }
 0x12d   :  { %v86_v22 = vmul.f32 0.03125, %v82_v21 }
 0x12f   :  { %v88_v23 = vadd.f32 1e-12, %v86_v22 }
 0x130   :  { %v85_v24 = vpop.xlane.xlu1 %84 }
 0x131   :  { %4110 = vrsqrt.f32 %v88_v23  ;;  %v87_v25 = vmul.f32 0.03125, %v85_v24 }
 0x133   :  { %v89_v26 = vadd.f32 1e-12, %v87_v25 }
 0x135   :  { %4112 = vrsqrt.f32 %v89_v26 }
 0x13b   :  { %v4111_v27 = vpop.eup %4110 }
 0x13c   :  { %v92_v28 = vmul.f32 %v4111_v27, %v76_v6 }
 0x13e   :  { %v100_v32 = vmul.f32 %v3623_v29, %v92_v28 }
 0x13f   :  { %v4113_v30 = vpop.eup %4112 }
 0x140   :  { %v93_v31 = vmul.f32 %v4113_v30, %v77_v10  ;;  %v4358_v35 = vadd.f32 %v3624_v33, %v100_v32 }
 0x142   :  { %v101_v34 = vmul.f32 %v3623_v29, %v93_v31 }
 0x144   :  { %v4360_v36 = vadd.f32 %v3624_v33, %v101_v34 }
 0x146   :  { %v116_v37 = vpack.c.bf16 %v4360_v36, %v4358_v35 }
 0x148   :  { %3829 = vmatmul.mubr.msk.bf16.vlgmr.msra.gmra.mrb[0].mxu0 %vm66_vm0, %v116_v37 }
 0x149   :  { %3849 = vmatprep.mubr.msk.f32.mxu0 %vm4207_vm1, %v4206_v14 }
 0x21b   :  { %v163_v39 = vpop.f32.mrb[0].mxu0 }
 0x21c   :  { %v4370_v40 = vadd.f32 %v3625_v38, %v163_v39  ;;  %v3830_v41 = vpop.f32.mrb[1].mxu0 }
 0x21d   :  { %v166_v42 = vpop.f32.mrb[2].mxu0 }
 0x21e   :  { %v4372_v43 = vadd.f32 %v3625_v38, %v166_v42  ;;  %171 = vrot.lane.b32.xlu0 %v4370_v40, %s4208_s24  ;;  %v3831_v44 = vpop.f32.mrb[3].mxu0 }
 0x220   :  { %249 = vrot.lane.b32.xlu1 %v4372_v43, %s4208_s24 }
 0x290   :  { %v172_v45 = vpop.permute.xlu0 %171 }
 0x291   :  { %3833 = vmatpush3.xpose.msk.msra.mxu1 %vm173_vm2, %v172_v45 }
 0x292   :  { %3837 = vmatprep.subr.mxu1 %v4206_v14  ;;  %v250_v46 = vpop.permute.xlu1 %249 }
 0x294   :  { %3835 = vmatmul.mubr.msk.f32.vlgmr.msra.gmra.mrb[0].mxu1 %vm173_vm2, %v4370_v40 }
 0x295   :  { %3838 = vmatpush3.xpose.msk.msra.mxu1 %vm173_vm2, %v250_v46  ;;  %3839 = vmatprep.mubr.msk.f32.mxu1 %vm4207_vm1, %v4206_v14 }
 0x296   :  { %3842 = vmatprep.subr.mxu1 %v4206_v14 }
 0x298   :  { %3840 = vmatmul.mubr.msk.f32.vlgmr.msra.gmra.mrb[2].mxu1 %vm173_vm2, %v4372_v43 }
 0x299   :  { %3844 = vmatprep.mubr.msk.f32.mxu1 %vm4207_vm1, %v4206_v14 }
 0x367   :  { %v244_v47 = vpop.f32.mrb[0].mxu1 }
 0x368   :  { %v325_v49 = vmul.f32 0.35355338, %v244_v47  ;;  %v3836_v50 = vpop.f32.mrb[1].mxu1 }
 0x36a   :  { %v339_v51 = vadd.f32 %v4393_v48, %v325_v49 }
 0x36b   :  { %v321_v52 = vpop.f32.mrb[2].mxu1 }
 0x36c   :  { %v326_v54 = vmul.f32 0.35355338, %v321_v52  ;;  %v3841_v55 = vpop.f32.mrb[3].mxu1  ;;  %v341_v56 = vsel %vm173_vm2, %v339_v51, -inf }
 0x36d   :  { %342 = vmax.xlane.f32.xlu1 %v341_v56 }
 0x36e   :  { %v340_v57 = vadd.f32 %v4399_v53, %v326_v54 }
 0x370   :  { %v344_v58 = vsel %vm173_vm2, %v340_v57, -inf }
 0x371   :  { %345 = vmax.xlane.f32.xlu0 %v344_v58 }
 0x37e   :  { %439 = vrot.lane.b32.xlu1 %v4372_v43, %s4209_s28 }
 0x382   :  { %517 = vrot.lane.b32.xlu1 %v4370_v40, %s4210_s29 }
 0x386   :  { %595 = vrot.lane.b32.xlu1 %v4372_v43, %s4210_s29 }
 0x387   :  { %363 = vrot.lane.b32.xlu0 %v4370_v40, %s4209_s28 }
 0x3fa   :  { %v343_v59 = vpop.xlane.xlu1 %342 }
 0x3fb   :  { %v347_v60 = vsub.f32 %v339_v51, %v343_v59 }
 0x3fd   :  { %v349_v61 = vmul.f32 1.442695, %v347_v60 }
 0x3fe   :  { %v346_v62 = vpop.xlane.xlu0 %345  ;;  %v440_v63 = vpop.permute.xlu1 %439 }
 0x3ff   :  { %4114 = vpow2.f32 %v349_v61  ;;  %v348_v0 = vsub.f32 %v340_v57, %v346_v62  ;;  %3848 = vmatpush3.msra.mxu0 %v440_v63 }
 0x400   :  { %3857 = vmatprep.subr.mxu0 %v4206_v14 }
 0x401   :  { %v351_v1 = vmul.f32 1.442695, %v348_v0 }
 0x402   :  { %v364_v2 = vpop.permute.xlu0 %363  ;;  %v518_v7 = vpop.permute.xlu1 %517 }
 0x403   :  { %4116 = vpow2.f32 %v351_v1  ;;  %3843 = vmatpush3.msra.mxu1 %v364_v2 }
 0x404   :  { %3852 = vmatprep.subr.mxu1 %v4206_v14 }
 0x406   :  { %v596_v8 = vpop.permute.xlu1 %595 }
 0x409   :  { %v4115_v3 = vpop.eup %4114 }
 0x40a   :  { %v353_v4 = vsel %vm173_vm2, %v4115_v3, 0.0 }
 0x40b   :  { %354 = vadd.xlane.f32.xlu0 %v353_v4 }
 0x40d   :  { %v4117_v5 = vpop.eup %4116 }
 0x40e   :  { %v356_v6 = vsel %vm173_vm2, %v4117_v5, 0.0 }
 0x40f   :  { %357 = vadd.xlane.f32.xlu1 %v356_v6 }
 0x420   :  { %593 = vrot.lane.b32.xlu1 %v4372_v43, %s4211_s0 }
 0x421   :  { %515 = vrot.lane.b32.xlu0 %v4370_v40, %s4211_s0 }
 0x498   :  { %v355_v9 = vpop.xlane.xlu0 %354 }
 0x499   :  { %4118 = vrcp.f32 %v355_v9 }
 0x49c   :  { %v358_v10 = vpop.xlane.xlu1 %357  ;;  %v516_v16 = vpop.permute.xlu0 %515 }
 0x49d   :  { %4120 = vrcp.f32 %v358_v10 }
 0x4a0   :  { %v594_v17 = vpop.permute.xlu1 %593 }
 0x4a3   :  { %v4119_v11 = vpop.eup %4118 }
 0x4a4   :  { %v361_v12 = vmul.f32 %v4119_v11, %v4115_v3 }
 0x4a6   :  { %3845 = vmatmul.mubr.msk.f32.vlgmr.msra.gmra.mrb[4].mxu1 %vm173_vm2, %v361_v12 }
 0x4a7   :  { %v4121_v13 = vpop.eup %4120  ;;  %3853 = vmatpush3.xpose.msk.msra.mxu1 %vm173_vm2, %v518_v7  ;;  %3854 = vmatprep.mubr.msk.f32.mxu1 %vm4207_vm1, %v4206_v14 }
 0x4a8   :  { %v362_v15 = vmul.f32 %v4121_v13, %v4117_v5  ;;  %3862 = vmatprep.subr.mxu1 %v4206_v14 }
 0x4aa   :  { %3850 = vmatmul.mubr.msk.f32.vlgmr.msra.gmra.mrb[4].mxu0 %vm173_vm2, %v362_v15  ;;  %3855 = vmatmul.mubr.msk.f32.vlgmr.msra.gmra.mrb[6].mxu1 %vm173_vm2, %v516_v16 }
 0x4ab   :  { %3858 = vmatpush3.xpose.msk.msra.mxu0 %vm173_vm2, %v596_v8  ;;  %3859 = vmatprep.mubr.msk.f32.mxu0 %vm4207_vm1, %v4206_v14 }
 0x4ac   :  { %3867 = vmatprep.subr.mxu0 %v4206_v14  ;;  %3864 = vmatprep.mubr.msk.f32.mxu1 %vm4207_vm1, %v4206_v14 }
 0x4ae   :  { %3860 = vmatmul.mubr.msk.f32.vlgmr.msra.gmra.mrb[6].mxu0 %vm173_vm2, %v594_v17 }
 0x4af   :  { %3869 = vmatprep.mubr.msk.f32.mxu0 %vm4207_vm1, %v4206_v14 }
 0x579   :  { %v4436_v18 = vpop.f32.mrb[4].mxu1 }
 0x57a   :  { %v3846_v19 = vpop.f32.mrb[5].mxu1 }
 0x57d   :  { %v4438_v20 = vpop.f32.mrb[4].mxu0  ;;  %v589_v21 = vpop.f32.mrb[6].mxu1 }
 0x57e   :  { %v671_v22 = vmul.f32 0.35355338, %v589_v21  ;;  %v3851_v23 = vpop.f32.mrb[5].mxu0  ;;  %v3856_v24 = vpop.f32.mrb[7].mxu1 }
 0x580   :  { %v673_v25 = vadd.f32 %v4393_v48, %v671_v22 }
 0x581   :  { %v667_v26 = vpop.f32.mrb[6].mxu0 }
 0x582   :  { %v672_v27 = vmul.f32 0.35355338, %v667_v26  ;;  %v3861_v28 = vpop.f32.mrb[7].mxu0  ;;  %v675_v29 = vsel %vm173_vm2, %v673_v25, -inf }
 0x583   :  { %676 = vmax.xlane.f32.xlu0 %v675_v29 }
 0x584   :  { %v674_v30 = vadd.f32 %v4399_v53, %v672_v27 }
 0x586   :  { %v678_v31 = vsel %vm173_vm2, %v674_v30, -inf }
 0x587   :  { %679 = vmax.xlane.f32.xlu1 %v678_v31 }
 0x598   :  { %773 = vrot.lane.b32.xlu1 %v4372_v43, %s4212_s30 }
 0x599   :  { %697 = vrot.lane.b32.xlu0 %v4370_v40, %s4212_s30 }
 0x59c   :  { %851 = vrot.lane.b32.xlu1 %v4370_v40, %s4213_s20 }
 0x5a0   :  { %929 = vrot.lane.b32.xlu1 %v4372_v43, %s4213_s20 }
 0x5a4   :  { %927 = vrot.lane.b32.xlu1 %v4372_v43, %s5005_s21 }
 0x610   :  { %v677_v32 = vpop.xlane.xlu0 %676 }
 0x611   :  { %v681_v33 = vsub.f32 %v673_v25, %v677_v32 }
 0x613   :  { %v683_v34 = vmul.f32 1.442695, %v681_v33 }
 0x614   :  { %v698_v37 = vpop.permute.xlu0 %697  ;;  %v680_v38 = vpop.xlane.xlu1 %679 }
 0x615   :  { %4122 = vpow2.f32 %v683_v34  ;;  %v682_v39 = vsub.f32 %v674_v30, %v680_v38  ;;  %3863 = vmatpush3.msra.mxu1 %v698_v37 }
 0x616   :  { %3872 = vmatprep.subr.mxu1 %v4206_v14 }
 0x617   :  { %v685_v41 = vmul.f32 1.442695, %v682_v39 }
 0x618   :  { %v774_v42 = vpop.permute.xlu1 %773 }
 0x619   :  { %4124 = vpow2.f32 %v685_v41  ;;  %3868 = vmatpush3.msra.mxu0 %v774_v42 }
 0x61a   :  { %3877 = vmatprep.subr.mxu0 %v4206_v14 }
 0x61c   :  { %v852_v51 = vpop.permute.xlu1 %851 }
 0x61f   :  { %v4123_v44 = vpop.eup %4122 }
 0x620   :  { %v687_v45 = vsel %vm173_vm2, %v4123_v44, 0.0  ;;  %v930_v56 = vpop.permute.xlu1 %929 }
 0x621   :  { %688 = vadd.xlane.f32.xlu0 %v687_v45 }
 0x623   :  { %v4125_v46 = vpop.eup %4124 }
 0x624   :  { %v690_v47 = vsel %vm173_vm2, %v4125_v46, 0.0  ;;  %v928_v59 = vpop.permute.xlu1 %927 }
 0x625   :  { %691 = vadd.xlane.f32.xlu0 %v690_v47 }
 0x63b   :  { %849 = vrot.lane.b32.xlu0 %v4370_v40, %s5005_s21  ;;  %s5021_s21 = smov 8  }
 0x6ae   :  { %v689_v49 = vpop.xlane.xlu0 %688 }
 0x6af   :  { %4126 = vrcp.f32 %v689_v49 }
 0x6b2   :  { %v692_v50 = vpop.xlane.xlu0 %691 }
 0x6b3   :  { %4128 = vrcp.f32 %v692_v50 }
 0x6b6   :  { %v850_v58 = vpop.permute.xlu0 %849 }
 0x6b9   :  { %v4127_v52 = vpop.eup %4126 }
 0x6ba   :  { %v695_v54 = vmul.f32 %v4127_v52, %v4123_v44 }
 0x6bc   :  { %3865 = vmatmul.mubr.msk.f32.vlgmr.msra.gmra.mrb[8].mxu1 %vm173_vm2, %v695_v54 }
 0x6bd   :  { %v4129_v55 = vpop.eup %4128  ;;  %3873 = vmatpush3.xpose.msk.msra.mxu1 %vm173_vm2, %v852_v51  ;;  %3874 = vmatprep.mubr.msk.f32.mxu1 %vm4207_vm1, %v4206_v14 }
 0x6be   :  { %v696_v57 = vmul.f32 %v4129_v55, %v4125_v46  ;;  %3882 = vmatprep.subr.mxu1 %v4206_v14 }
 0x6c0   :  { %3870 = vmatmul.mubr.msk.f32.vlgmr.msra.gmra.mrb[8].mxu0 %vm173_vm2, %v696_v57  ;;  %3875 = vmatmul.mubr.msk.f32.vlgmr.msra.gmra.mrb[10].mxu1 %vm173_vm2, %v850_v58 }
 0x6c1   :  { %3878 = vmatpush3.xpose.msk.msra.mxu0 %vm173_vm2, %v930_v56  ;;  %3879 = vmatprep.mubr.msk.f32.mxu0 %vm4207_vm1, %v4206_v14 }
 0x6c2   :  { %3887 = vmatprep.subr.mxu0 %v4206_v14  ;;  %3884 = vmatprep.mubr.msk.f32.mxu1 %vm4207_vm1, %v4206_v14 }
 0x6c4   :  { %3880 = vmatmul.mubr.msk.f32.vlgmr.msra.gmra.mrb[10].mxu0 %vm173_vm2, %v928_v59 }
 0x6c5   :  { %3889 = vmatprep.mubr.msk.f32.mxu0 %vm4207_vm1, %v4206_v14 }
 0x78f   :  { %v4476_v60 = vpop.f32.mrb[8].mxu1 }
 0x790   :  { %v3866_v61 = vpop.f32.mrb[9].mxu1 }
 0x793   :  { %v4478_v62 = vpop.f32.mrb[8].mxu0  ;;  %v923_v63 = vpop.f32.mrb[10].mxu1 }
 0x794   :  { %v4080_v0 = vpack.i.bf16 %v4478_v62, %v4476_v60  ;;  %v1005_v1 = vmul.f32 0.35355338, %v923_v63  ;;  %v3871_v2 = vpop.f32.mrb[9].mxu0  ;;  %v3876_v3 = vpop.f32.mrb[11].mxu1 }
 0x796   :  { %v1007_v4 = vadd.f32 %v4393_v48, %v1005_v1 }
 0x797   :  { %v1001_v5 = vpop.f32.mrb[10].mxu0 }
 0x798   :  { %v1006_v6 = vmul.f32 0.35355338, %v1001_v5  ;;  %v3881_v7 = vpop.f32.mrb[11].mxu0  ;;  %v1009_v8 = vsel %vm173_vm2, %v1007_v4, -inf }
 0x799   :  { %1010 = vmax.xlane.f32.xlu0 %v1009_v8 }
 0x79a   :  { %v1008_v9 = vadd.f32 %v4399_v53, %v1006_v6 }
 0x79c   :  { %v1012_v10 = vsel %vm173_vm2, %v1008_v9, -inf }
 0x79d   :  { %1013 = vmax.xlane.f32.xlu1 %v1012_v10  ;;  %v1550_v10 = vld [vmem:[%s4979_s6 + $0x8] sm:$0xff] }
 0x7ae   :  { %1107 = vrot.lane.b32.xlu1 %v4372_v43, %s5003_s4 }
 0x7af   :  { %1031 = vrot.lane.b32.xlu0 %v4370_v40, %s5003_s4  ;;  %s5022_s4 = smov 16  }
 0x7b2   :  { %1185 = vrot.lane.b32.xlu1 %v4370_v40, %s5001_s22 }
 0x7b6   :  { %1263 = vrot.lane.b32.xlu1 %v4372_v43, %s5001_s22 }
 0x7ba   :  { %1261 = vrot.lane.b32.xlu1 %v4372_v43, %s4999_s2 }
 0x826   :  { %v1011_v11 = vpop.xlane.xlu0 %1010 }
 0x827   :  { %v1015_v12 = vsub.f32 %v1007_v4, %v1011_v11 }
 0x829   :  { %v1017_v13 = vmul.f32 1.442695, %v1015_v12  ;;  %v1551_v12 = vld [vmem:[%s4979_s6 + $0x10] sm:$0xff] }
 0x82a   :  { %v1032_v15 = vpop.permute.xlu0 %1031  ;;  %v1014_v16 = vpop.xlane.xlu1 %1013 }
 0x82b   :  { %4130 = vpow2.f32 %v1017_v13  ;;  %v1016_v17 = vsub.f32 %v1008_v9, %v1014_v16  ;;  %3883 = vmatpush3.msra.mxu1 %v1032_v15  ;;  %v1552_v13 = vld [vmem:[%s4979_s6 + $0x18] sm:$0xff] }
 0x82c   :  { %3892 = vmatprep.subr.mxu1 %v4206_v14  ;;  %v1555_v15 = vpack.c.bf16 %v1552_v13, %v1551_v12 }
 0x82d   :  { %v1019_v19 = vmul.f32 1.442695, %v1016_v17 }
 0x82e   :  { %v1108_v21 = vpop.permute.xlu1 %1107 }
 0x82f   :  { %4132 = vpow2.f32 %v1019_v19  ;;  %3888 = vmatpush3.msra.mxu0 %v1108_v21 }
 0x830   :  { %3897 = vmatprep.subr.mxu0 %v4206_v14 }
 0x832   :  { %v1186_v28 = vpop.permute.xlu1 %1185 }
 0x835   :  { %v4131_v22 = vpop.eup %4130 }
 0x836   :  { %v1021_v23 = vsel %vm173_vm2, %v4131_v22, 0.0  ;;  %v1264_v32 = vpop.permute.xlu1 %1263 }
 0x837   :  { %1022 = vadd.xlane.f32.xlu0 %v1021_v23 }
 0x839   :  { %v4133_v24 = vpop.eup %4132 }
 0x83a   :  { %v1024_v25 = vsel %vm173_vm2, %v4133_v24, 0.0  ;;  %v1262_v37 = vpop.permute.xlu1 %1261 }
 0x83b   :  { %1025 = vadd.xlane.f32.xlu0 %v1024_v25 }
 0x851   :  { %1183 = vrot.lane.b32.xlu0 %v4370_v40, %s4999_s2 }
 0x8c4   :  { %v1023_v26 = vpop.xlane.xlu0 %1022 }
 0x8c5   :  { %4134 = vrcp.f32 %v1023_v26 }
 0x8c8   :  { %v1026_v27 = vpop.xlane.xlu0 %1025 }
 0x8c9   :  { %4136 = vrcp.f32 %v1026_v27 }
 0x8cc   :  { %v1184_v34 = vpop.permute.xlu0 %1183 }
 0x8cf   :  { %v4135_v29 = vpop.eup %4134 }
 0x8d0   :  { %v1029_v30 = vmul.f32 %v4135_v29, %v4131_v22 }
 0x8d2   :  { %3885 = vmatmul.mubr.msk.f32.vlgmr.msra.gmra.mrb[12].mxu1 %vm173_vm2, %v1029_v30 }
 0x8d3   :  { %v4137_v31 = vpop.eup %4136  ;;  %3893 = vmatpush3.xpose.msk.msra.mxu1 %vm173_vm2, %v1186_v28  ;;  %3894 = vmatprep.mubr.msk.f32.mxu1 %vm4207_vm1, %v4206_v14 }
 0x8d4   :  { %v1030_v33 = vmul.f32 %v4137_v31, %v4133_v24  ;;  %3902 = vmatprep.subr.mxu1 %v4206_v14 }
 0x8d6   :  { %3890 = vmatmul.mubr.msk.f32.vlgmr.msra.gmra.mrb[12].mxu0 %vm173_vm2, %v1030_v33  ;;  %3895 = vmatmul.mubr.msk.f32.vlgmr.msra.gmra.mrb[14].mxu1 %vm173_vm2, %v1184_v34 }
 0x8d7   :  { %3898 = vmatpush3.xpose.msk.msra.mxu0 %vm173_vm2, %v1264_v32  ;;  %3899 = vmatprep.mubr.msk.f32.mxu0 %vm4207_vm1, %v4206_v14 }
 0x8d8   :  { %3907 = vmatprep.subr.mxu0 %v4206_v14  ;;  %3904 = vmatprep.mubr.msk.f32.mxu1 %vm4207_vm1, %v4206_v14 }
 0x8da   :  { %3900 = vmatmul.mubr.msk.f32.vlgmr.msra.gmra.mrb[14].mxu0 %vm173_vm2, %v1262_v37 }
 0x8db   :  { %3909 = vmatprep.mubr.msk.f32.mxu0 %vm4207_vm1, %v4206_v14 }
 0x9a5   :  { %v1103_v38 = vpop.f32.mrb[12].mxu1 }
 0x9a6   :  { %v3886_v39 = vpop.f32.mrb[13].mxu1 }
 0x9a9   :  { %v1179_v41 = vpop.f32.mrb[12].mxu0  ;;  %v1257_v42 = vpop.f32.mrb[14].mxu1 }
 0x9aa   :  { %v4085_v44 = vpack.i.bf16 %v1179_v41, %v1103_v38  ;;  %v1339_v45 = vmul.f32 0.35355338, %v1257_v42  ;;  %v3891_v46 = vpop.f32.mrb[13].mxu0  ;;  %v3896_v47 = vpop.f32.mrb[15].mxu1 }
 0x9ac   :  { %v1341_v49 = vadd.f32 %v4393_v48, %v1339_v45 }
 0x9ad   :  { %v1335_v50 = vpop.f32.mrb[14].mxu0 }
 0x9ae   :  { %v1340_v51 = vmul.f32 0.35355338, %v1335_v50  ;;  %v3901_v52 = vpop.f32.mrb[15].mxu0  ;;  %v1343_v54 = vsel %vm173_vm2, %v1341_v49, -inf }
 0x9af   :  { %1344 = vmax.xlane.f32.xlu0 %v1343_v54 }
 0x9b0   :  { %v1342_v55 = vadd.f32 %v4399_v53, %v1340_v51 }
 0x9b2   :  { %v1346_v56 = vsel %vm173_vm2, %v1342_v55, -inf }
 0x9b3   :  { %1347 = vmax.xlane.f32.xlu1 %v1346_v56 }
 0x9c4   :  { %1441 = vrot.lane.b32.xlu1 %v4372_v43, %s4997_s25 }
 0x9c8   :  { %4081 = vrot.lane.b32.xlu1 %v4080_v0, %s4996_s3 }
 0x9cc   :  { %4086 = vrot.lane.b32.xlu1 %v4085_v44, %s4995_s26 }
 0xa3c   :  { %v1345_v57 = vpop.xlane.xlu0 %1344 }
 0xa3d   :  { %v1349_v58 = vsub.f32 %v1341_v49, %v1345_v57 }
 0xa3f   :  { %v1351_v59 = vmul.f32 1.442695, %v1349_v58 }
 0xa40   :  { %v1348_v61 = vpop.xlane.xlu1 %1347 }
 0xa41   :  { %4138 = vpow2.f32 %v1351_v59  ;;  %v1350_v63 = vsub.f32 %v1342_v55, %v1348_v61 }
 0xa43   :  { %v1353_v1 = vmul.f32 1.442695, %v1350_v63 }
 0xa44   :  { %v1442_v2 = vpop.permute.xlu1 %1441 }
 0xa45   :  { %4140 = vpow2.f32 %v1353_v1  ;;  %3908 = vmatpush3.msra.mxu0 %v1442_v2  ;;  %v1654_v2 = vld [vmem:[%s4981_s10 + $0x8] sm:$0xff] }
 0xa46   :  { %3920 = vmatprep.subr.bf16.mxu0 %v4206_v14 }
 0xa48   :  { %v4082_v23 = vpop.permute.xlu1 %4081 }
 0xa49   :  { %v4084_v25 = vunpack.i.h.bf16 %v4082_v23  ;;  %v4083_v26 = vunpack.i.l.bf16 %v4082_v23  ;;  %v1722_v23 = vld [vmem:[%s4984_s12 + $0x8] sm:$0xff] }
 0xa4b   :  { %v4139_v43 = vpop.eup %4138  ;;  %v1542_v30 = vsel %vm173_vm2, %v4438_v20, %v4084_v25  ;;  %v1541_v31 = vsel %vm173_vm2, %v4436_v18, %v4083_v26  ;;  %v3653_v18 = vld [vmem:[%s4980_s7] ss:$0 sm:$0xff]  ;;  %v1723_v25 = vld [vmem:[%s4984_s12 + $0x10] sm:$0xff]  ;;  %v1724_v26 = vld [vmem:[%s4984_s12 + $0x18] sm:$0xff] }
 0xa4c   :  { %v1355_v3 = vsel %vm173_vm2, %v4139_v43, 0.0  ;;  %v4087_v24 = vpop.permute.xlu1 %4086 }
 0xa4d   :  { %1356 = vadd.xlane.f32.xlu0 %v1355_v3  ;;  %v4089_v27 = vunpack.i.h.bf16 %v4087_v24  ;;  %v4088_v28 = vunpack.i.l.bf16 %v4087_v24  ;;  %v1655_v3 = vld [vmem:[%s4981_s10 + $0x10] sm:$0xff] }
 0xa4f   :  { %v4141_v60 = vpop.eup %4140  ;;  %v1544_v34 = vsel %vm1543_vm3, %v1541_v31, %v4088_v28  ;;  %v1545_v37 = vsel %vm1543_vm3, %v1542_v30, %v4089_v27  ;;  %v1731_v27 = vpack.c.bf16 %v1724_v26, %v1723_v25  ;;  %v1725_v28 = vld [vmem:[%s4984_s12 + $0x20] sm:$0xff]  ;;  %v1727_v31 = vld [vmem:[%s4984_s12 + $0x30] sm:$0xff] }
 0xa50   :  { %v1358_v62 = vsel %vm173_vm2, %v4141_v60, 0.0  ;;  %v3661_v25 = vld [vmem:[%s4987_s14] ss:$0 sm:$0xff] }
 0xa51   :  { %1359 = vadd.xlane.f32.xlu0 %v1358_v62 }
 0xa67   :  { %1365 = vrot.lane.b32.xlu0 %v4370_v40, %s4997_s25  ;;  %v1549_v40 = vld [vmem:[%s4979_s6] sm:$0xff]  ;;  %s5007_s25 = smov 24  }
 0xa68   :  { %v1554_v11 = vpack.c.bf16 %v1550_v10, %v1549_v40  ;;  %v3655_v10 = vld [vmem:[%s4982_s8] ss:$0 sm:$0xff] }
 0xada   :  { %v1357_v0 = vpop.xlane.xlu0 %1356 }
 0xadb   :  { %4142 = vrcp.f32 %v1357_v0 }
 0xade   :  { %v1360_v4 = vpop.xlane.xlu0 %1359 }
 0xadf   :  { %4144 = vrcp.f32 %v1360_v4 }
 0xae2   :  { %v1366_v5 = vpop.permute.xlu0 %1365 }
 0xae3   :  { %3903 = vmatpush3.msra.mxu1 %v1366_v5 }
 0xae4   :  { %3912 = vmatprep.subr.bf16.mxu1 %v4206_v14 }
 0xae5   :  { %v4143_v6 = vpop.eup %4142 }
 0xae6   :  { %v1363_v7 = vmul.f32 %v4143_v6, %v4139_v43 }
 0xae8   :  { %3905 = vmatmul.mubr.msk.f32.vlgmr.msra.gmra.mrb[16].mxu1 %vm173_vm2, %v1363_v7 }
 0xae9   :  { %v4145_v8 = vpop.eup %4144  ;;  %3916 = vmatprep.mubr.msk.bf16.mxu1 %vm4207_vm1, %v4206_v14  ;;  %3913 = vmatpush3.bf16.msra.mxu1 %v1554_v11 }
 0xaea   :  { %v1364_v9 = vmul.f32 %v4145_v8, %v4141_v60  ;;  %3914 = vmatprep.subr.bf16.mxu1 %v4206_v14  ;;  %v1656_v60 = vld [vmem:[%s4981_s10 + $0x18] sm:$0xff] }
 0xaeb   :  { %v1659_v62 = vpack.c.bf16 %v1656_v60, %v1655_v3 }
 0xaec   :  { %3910 = vmatmul.mubr.msk.f32.vlgmr.msra.gmra.mrb[16].mxu0 %vm173_vm2, %v1364_v9 }
 0xaed   :  { %3924 = vmatprep.mubr.msk.bf16.mxu0 %vm4207_vm1, %v4206_v14  ;;  %3915 = vmatpush3.bf16.msra.mxu1 %v1555_v15  ;;  %v3656_v15 = vld [vmem:[%s4983_s9] ss:$0 sm:$0xff] }
 0xaee   :  { %3928 = vmatprep.subr.bf16.mxu1 %v4206_v14 }
 0xbbb   :  { %v1437_v16 = vpop.f32.mrb[16].mxu1 }
 0xbbc   :  { %v3906_v17 = vpop.f32.mrb[17].mxu1 }
 0xbbf   :  { %v1513_v19 = vpop.f32.mrb[16].mxu0 }
 0xbc0   :  { %v4090_v21 = vpack.i.bf16 %v1513_v19, %v1437_v16  ;;  %v3911_v22 = vpop.f32.mrb[17].mxu0 }
 0xbc1   :  { %v1721_v22 = vld [vmem:[%s4984_s12] sm:$0xff] }
 0xbc2   :  { %4091 = vrot.lane.b32.xlu0 %v4090_v21, %s5007_s25  ;;  %v1730_v24 = vpack.c.bf16 %v1722_v23, %v1721_v22 }
 0xc34   :  { %v4092_v29 = vpop.permute.xlu0 %4091 }
 0xc35   :  { %v4094_v32 = vunpack.i.h.bf16 %v4092_v29  ;;  %v4093_v33 = vunpack.i.l.bf16 %v4092_v29  ;;  %v1726_v29 = vld [vmem:[%s4984_s12 + $0x28] sm:$0xff] }
 0xc36   :  { %v1732_v30 = vpack.c.bf16 %v1726_v29, %v1725_v28 }
 0xc37   :  { %v1548_v38 = vsel %vm1546_vm4, %v1545_v37, %v4094_v32  ;;  %v1547_v39 = vsel %vm1546_vm4, %v1544_v34, %v4093_v33  ;;  %v1728_v32 = vld [vmem:[%s4984_s12 + $0x38] sm:$0xff]  ;;  %v3657_v34 = vld [vmem:[%s4985_s11] ss:$0 sm:$0xff] }
 0xc38   :  { %v1553_v41 = vpack.c.bf16 %v1548_v38, %v1547_v39  ;;  %v1733_v33 = vpack.c.bf16 %v1728_v32, %v1727_v31 }
 0xc3a   :  { %3917 = vmatmul.mubr.msk.bf16.vlgmr.msra.gmra.mrb[20].mxu1 %vm66_vm0, %v1553_v41 }
 0xc3b   :  { %3936 = vmatprep.mubr.msk.bf16.mxu1 %vm4207_vm1, %v4206_v14  ;;  %3929 = vmatpush3.bf16.msra.mxu1 %v1730_v24 }
 0xc3c   :  { %3930 = vmatprep.subr.bf16.mxu1 %v4206_v14 }
 0xc3f   :  { %3931 = vmatpush3.bf16.msra.mxu1 %v1731_v27 }
 0xc40   :  { %3932 = vmatprep.subr.bf16.mxu1 %v4206_v14 }
 0xc43   :  { %3933 = vmatpush3.bf16.msra.mxu1 %v1732_v30  ;;  %v3662_v30 = vld [vmem:[%s4988_s15] ss:$0 sm:$0xff] }
 0xc44   :  { %3934 = vmatprep.subr.bf16.mxu1 %v4206_v14 }
 0xc47   :  { %3935 = vmatpush3.bf16.msra.mxu1 %v1733_v33 }
 0xc48   :  { %3958 = vmatprep.subr.mxu1 %v4206_v14 }
 0xd0d   :  { %v1600_v20 = vpop.f32.mrb[20].mxu1 }
 0xd0e   :  { %v1601_v42 = vadd.f32 %v3653_v18, %v1600_v20  ;;  %v3918_v44 = vpop.f32.mrb[21].mxu1 }
 0xd0f   :  { %v1603_v45 = vpop.f32.mrb[22].mxu1 }
 0xd10   :  { %v1604_v46 = vadd.f32 %v3653_v18, %v1603_v45  ;;  %v3919_v47 = vpop.f32.mrb[23].mxu1  ;;  %v1607_v49 = vadd.f32 %v1601_v42, %v4358_v35 }
 0xd12   :  { %v1611_v50 = vsel %vm66_vm0, %v1607_v49, 0.0  ;;  %v1608_v51 = vadd.f32 %v1604_v46, %v4360_v36  ;;  %v1653_v36 = vld [vmem:[%s4981_s10] sm:$0xff] }
 0xd13   :  { %1612 = vadd.xlane.f32.xlu1 %v1611_v50  ;;  %v1658_v43 = vpack.c.bf16 %v1654_v2, %v1653_v36 }
 0xd14   :  { %v1614_v52 = vsel %vm66_vm0, %v1608_v51, 0.0 }
 0xd15   :  { %1615 = vadd.xlane.f32.xlu0 %v1614_v52  ;;  %3921 = vmatpush3.bf16.msra.mxu0 %v1658_v43 }
 0xd16   :  { %3922 = vmatprep.subr.bf16.mxu0 %v4206_v14 }
 0xd19   :  { %3923 = vmatpush3.bf16.msra.mxu0 %v1659_v62 }
 0xd1a   :  { %3940 = vmatprep.subr.bf16.mxu0 %v4206_v14 }
 0xda0   :  { %v1613_v54 = vpop.xlane.xlu1 %1612 }
 0xda1   :  { %v1617_v55 = vmul.f32 0.03125, %v1613_v54 }
 0xda2   :  { %v1616_v56 = vpop.xlane.xlu0 %1615 }
 0xda3   :  { %v1619_v57 = vsub.f32 %v1607_v49, %v1617_v55  ;;  %v1618_v58 = vmul.f32 0.03125, %v1616_v56  ;;  %v3659_v56 = vld [vmem:[%s4986_s13] ss:$0 sm:$0xff] }
 0xda5   :  { %v1620_v59 = vsub.f32 %v1608_v51, %v1618_v58  ;;  %v1621_v61 = vmul.f32 %v1619_v57, %v1619_v57 }
 0xda7   :  { %v1623_v63 = vsel %vm66_vm0, %v1621_v61, 0.0  ;;  %v1622_v1 = vmul.f32 %v1620_v59, %v1620_v59 }
 0xda8   :  { %1624 = vadd.xlane.f32.xlu0 %v1623_v63 }
 0xda9   :  { %v1626_v35 = vsel %vm66_vm0, %v1622_v1, 0.0 }
 0xdac   :  { %1627 = vadd.xlane.f32.xlu0 %v1626_v35 }
 0xe35   :  { %v1625_v0 = vpop.xlane.xlu0 %1624 }
 0xe36   :  { %v1629_v4 = vmul.f32 0.03125, %v1625_v0 }
 0xe38   :  { %v1631_v5 = vadd.f32 1e-12, %v1629_v4 }
 0xe39   :  { %v1628_v6 = vpop.xlane.xlu0 %1627 }
 0xe3a   :  { %4146 = vrsqrt.f32 %v1631_v5  ;;  %v1630_v7 = vmul.f32 0.03125, %v1628_v6 }
 0xe3c   :  { %v1632_v8 = vadd.f32 1e-12, %v1630_v7 }
 0xe3e   :  { %4148 = vrsqrt.f32 %v1632_v8 }
 0xe44   :  { %v4147_v9 = vpop.eup %4146 }
 0xe45   :  { %v1635_v40 = vmul.f32 %v4147_v9, %v1619_v57 }
 0xe47   :  { %v1643_v12 = vmul.f32 %v3655_v10, %v1635_v40  ;;  %v3663_v40 = vld [vmem:[%s5013_s23 + $0x20] sm:$0xff] }
 0xe48   :  { %v4149_v11 = vpop.eup %4148 }
 0xe49   :  { %v1636_v13 = vmul.f32 %v4149_v11, %v1620_v59  ;;  %v1651_v17 = vadd.f32 %v3656_v15, %v1643_v12  ;;  %v3665_v12 = vld [vmem:[%s5013_s23 + $0x30] sm:$0xff] }
 0xe4b   :  { %v1644_v16 = vmul.f32 %v3655_v10, %v1636_v13  ;;  %v3664_v10 = vld [vmem:[%s5013_s23 + $0x28] sm:$0xff]  ;;  %v3666_v13 = vld [vmem:[%s5013_s23 + $0x38] sm:$0xff] }
 0xe4c   :  { %v1838_v11 = vpack.c.bf16 %v3664_v10, %v3663_v40 }
 0xe4d   :  { %v1652_v19 = vadd.f32 %v3656_v15, %v1644_v16  ;;  %v1839_v15 = vpack.c.bf16 %v3666_v13, %v3665_v12 }
 0xe4f   :  { %v1657_v21 = vpack.c.bf16 %v1652_v19, %v1651_v17 }
 0xe51   :  { %3925 = vmatmul.mubr.msk.bf16.vlgmr.msra.gmra.mrb[20].mxu0 %vm66_vm0, %v1657_v21 }
 0xe52   :  { %3944 = vmatprep.mubr.msk.bf16.mxu0 %vm4207_vm1, %v4206_v14  ;;  %3941 = vmatpush3.bf16.msra.mxu0 %v1838_v11 }
 0xe53   :  { %3942 = vmatprep.subr.bf16.mxu0 %v4206_v14 }
 0xe56   :  { %3943 = vmatpush3.bf16.msra.mxu0 %v1839_v15 }
 0xe57   :  { %3948 = vmatprep.subr.mxu0 %v4206_v14 }
 0xf24   :  { %v1704_v37 = vpop.f32.mrb[20].mxu0 }
 0xf25   :  { %v1705_v38 = vadd.f32 %v3657_v34, %v1704_v37  ;;  %v3926_v39 = vpop.f32.mrb[21].mxu0  ;;  %v3668_v37 = vld [vmem:[%s4977_s5 + $0x1] ss:$0 sm:$0xff] }
 0xf26   :  { %v1707_v41 = vpop.f32.mrb[22].mxu0 }
 0xf27   :  { %v1713_v18 = vmul.f32 0.70710677, %v1705_v38  ;;  %v1708_v20 = vadd.f32 %v3657_v34, %v1707_v41  ;;  %v3927_v42 = vpop.f32.mrb[23].mxu0  ;;  %v1711_v49 = vmul.f32 0.5, %v1705_v38 }
 0xf29   :  { %4150 = verf.f32 %v1713_v18  ;;  %v1714_v44 = vmul.f32 0.70710677, %v1708_v20  ;;  %v1712_v50 = vmul.f32 0.5, %v1708_v20 }
 0xf2b   :  { %4152 = verf.f32 %v1714_v44 }
 0xf33   :  { %v4151_v45 = vpop.eup %4150 }
 0xf34   :  { %v1717_v46 = vadd.f32 1.0, %v4151_v45 }
 0xf35   :  { %v4153_v47 = vpop.eup %4152 }
 0xf36   :  { %v1718_v51 = vadd.f32 1.0, %v4153_v47  ;;  %v1719_v52 = vmul.f32 %v1717_v46, %v1711_v49 }
 0xf38   :  { %v1720_v54 = vmul.f32 %v1718_v51, %v1712_v50 }
 0xf3a   :  { %v1729_v55 = vpack.c.bf16 %v1720_v54, %v1719_v52 }
 0xf3c   :  { %3937 = vmatmul.mubr.msk.bf16.vlgmr.msra.gmra.mrb[24].mxu1 %vm1741_vm5, %v1729_v55 }
 0xf3d   :  { %3960 = vmatprep.mubr.msk.f32.mxu1 %vm4207_vm1, %v4206_v14 }
0x100f   :  { %v1779_v57 = vpop.f32.mrb[24].mxu1 }
0x1010   :  { %v1780_v58 = vadd.f32 %v3659_v56, %v1779_v57  ;;  %v3938_v59 = vpop.f32.mrb[25].mxu1 }
0x1011   :  { %v1782_v61 = vpop.f32.mrb[26].mxu1 }
0x1012   :  { %v1783_v63 = vadd.f32 %v3659_v56, %v1782_v61  ;;  %v3939_v1 = vpop.f32.mrb[27].mxu1  ;;  %v1786_v35 = vadd.f32 %v1780_v58, %v1651_v17 }
0x1014   :  { %v1790_v36 = vsel %vm66_vm0, %v1786_v35, 0.0  ;;  %v1787_v2 = vadd.f32 %v1783_v63, %v1652_v19 }
0x1015   :  { %1791 = vadd.xlane.f32.xlu1 %v1790_v36 }
0x1016   :  { %v1793_v43 = vsel %vm66_vm0, %v1787_v2, 0.0 }
0x1017   :  { %1794 = vadd.xlane.f32.xlu0 %v1793_v43 }
0x10a2   :  { %v1792_v3 = vpop.xlane.xlu1 %1791 }
0x10a3   :  { %v1796_v60 = vmul.f32 0.03125, %v1792_v3 }
0x10a4   :  { %v1795_v62 = vpop.xlane.xlu0 %1794 }
0x10a5   :  { %v1798_v0 = vsub.f32 %v1786_v35, %v1796_v60  ;;  %v1797_v4 = vmul.f32 0.03125, %v1795_v62 }
0x10a7   :  { %v1799_v5 = vsub.f32 %v1787_v2, %v1797_v4  ;;  %v1800_v6 = vmul.f32 %v1798_v0, %v1798_v0 }
0x10a9   :  { %v1802_v7 = vsel %vm66_vm0, %v1800_v6, 0.0  ;;  %v1801_v8 = vmul.f32 %v1799_v5, %v1799_v5 }
0x10aa   :  { %1803 = vadd.xlane.f32.xlu1 %v1802_v7 }
0x10ab   :  { %v1805_v9 = vsel %vm66_vm0, %v1801_v8, 0.0 }
0x10ac   :  { %1806 = vadd.xlane.f32.xlu0 %v1805_v9 }
0x1137   :  { %v1804_v16 = vpop.xlane.xlu1 %1803 }
0x1138   :  { %v1808_v17 = vmul.f32 0.03125, %v1804_v16 }
0x1139   :  { %v1807_v19 = vpop.xlane.xlu0 %1806 }
0x113a   :  { %v1810_v21 = vadd.f32 1e-12, %v1808_v17  ;;  %v1809_v22 = vmul.f32 0.03125, %v1807_v19  ;;  %v4735_v19 = vld [vmem:[%s4978_s1] ss:$0 sm:$0xff] }
0x113c   :  { %4154 = vrsqrt.f32 %v1810_v21  ;;  %v1811_v23 = vadd.f32 1e-12, %v1809_v22 }
0x113e   :  { %4156 = vrsqrt.f32 %v1811_v23 }
0x1146   :  { %v4155_v24 = vpop.eup %4154 }
0x1147   :  { %v1814_v26 = vmul.f32 %v4155_v24, %v1798_v0 }
0x1148   :  { %v4157_v27 = vpop.eup %4156 }
0x1149   :  { %v1822_v28 = vmul.f32 %v3661_v25, %v1814_v26  ;;  %v1815_v29 = vmul.f32 %v4157_v27, %v1799_v5  ;;  %v4742_v26 = vld [vmem:[%s4978_s1 + $0x1] ss:$0 sm:$0xff]  ;;  %s5017_s1 = smov 48  }
0x114b   :  { %v1823_v31 = vmul.f32 %v3661_v25, %v1815_v29  ;;  %v4660_v32 = vadd.f32 %v3662_v30, %v1822_v28 }
0x114d   :  { %v4662_v33 = vadd.f32 %v3662_v30, %v1823_v31 }
0x114f   :  { %v1837_v34 = vpack.c.bf16 %v4662_v33, %v4660_v32 }
0x1151   :  { %3945 = vmatmul.mubr.msk.bf16.vlgmr.msra.gmra.mrb[24].mxu0 %vm66_vm0, %v1837_v34 }
0x1152   :  { %3950 = vmatprep.mubr.msk.f32.mxu0 %vm4207_vm1, %v4206_v14 }
0x1224   :  { %v1885_v38 = vpop.f32.mrb[24].mxu0 }
0x1225   :  { %v4672_v39 = vadd.f32 %v3668_v37, %v1885_v38  ;;  %v3946_v41 = vpop.f32.mrb[25].mxu0 }
0x1226   :  { %v1888_v18 = vpop.f32.mrb[26].mxu0 }
0x1227   :  { %v4674_v20 = vadd.f32 %v3668_v37, %v1888_v18  ;;  %1893 = vrot.lane.b32.xlu1 %v4672_v39, %s4208_s24  ;;  %v3947_v42 = vpop.f32.mrb[27].mxu0 }
0x1229   :  { %1970 = vrot.lane.b32.xlu0 %v4674_v20, %s4208_s24 }
0x1299   :  { %v1894_v44 = vpop.permute.xlu1 %1893 }
0x129a   :  { %3949 = vmatpush3.xpose.msk.msra.mxu0 %vm173_vm2, %v1894_v44 }
0x129b   :  { %3953 = vmatprep.subr.mxu0 %v4206_v14  ;;  %v1971_v45 = vpop.permute.xlu0 %1970 }
0x129d   :  { %3951 = vmatmul.mubr.msk.f32.vlgmr.msra.gmra.mrb[18].mxu0 %vm173_vm2, %v4672_v39 }
0x129e   :  { %3954 = vmatpush3.xpose.msk.msra.mxu0 %vm173_vm2, %v1971_v45  ;;  %3955 = vmatprep.mubr.msk.f32.mxu0 %vm4207_vm1, %v4206_v14 }
0x129f   :  { %3963 = vmatprep.subr.mxu0 %v4206_v14 }
0x12a1   :  { %3956 = vmatmul.mubr.msk.f32.vlgmr.msra.gmra.mrb[28].mxu0 %vm173_vm2, %v4674_v20 }
0x12a2   :  { %3965 = vmatprep.mubr.msk.f32.mxu0 %vm4207_vm1, %v4206_v14 }
0x1370   :  { %v1965_v46 = vpop.f32.mrb[18].mxu0 }
0x1371   :  { %v2046_v47 = vmul.f32 0.35355338, %v1965_v46  ;;  %v3952_v49 = vpop.f32.mrb[19].mxu0 }
0x1373   :  { %v2048_v50 = vadd.f32 %v4393_v48, %v2046_v47 }
0x1374   :  { %v2042_v51 = vpop.f32.mrb[28].mxu0 }
0x1375   :  { %v2047_v52 = vmul.f32 0.35355338, %v2042_v51  ;;  %v3957_v54 = vpop.f32.mrb[29].mxu0  ;;  %v2050_v55 = vsel %vm173_vm2, %v2048_v50, -inf }
0x1376   :  { %2051 = vmax.xlane.f32.xlu1 %v2050_v55 }
0x1377   :  { %v2049_v56 = vadd.f32 %v4399_v53, %v2047_v52 }
0x1379   :  { %v2053_v57 = vsel %vm173_vm2, %v2049_v56, -inf }
0x137a   :  { %2054 = vmax.xlane.f32.xlu0 %v2053_v57 }
0x1387   :  { %2072 = vrot.lane.b32.xlu1 %v4672_v39, %s4209_s28 }
0x138b   :  { %2226 = vrot.lane.b32.xlu1 %v4672_v39, %s4210_s29 }
0x138f   :  { %2304 = vrot.lane.b32.xlu1 %v4674_v20, %s4210_s29 }
0x1390   :  { %2148 = vrot.lane.b32.xlu0 %v4674_v20, %s4209_s28  ;;  %s5023_s28 = smov 24  }
0x1403   :  { %v2052_v48 = vpop.xlane.xlu1 %2051 }
0x1404   :  { %v2056_v58 = vsub.f32 %v2048_v50, %v2052_v48 }
0x1406   :  { %v2058_v59 = vmul.f32 1.442695, %v2056_v58 }
0x1407   :  { %v2073_v61 = vpop.permute.xlu1 %2072  ;;  %v2055_v53 = vpop.xlane.xlu0 %2054 }
0x1408   :  { %4158 = vpow2.f32 %v2058_v59  ;;  %v2057_v63 = vsub.f32 %v2049_v56, %v2055_v53  ;;  %3959 = vmatpush3.msra.mxu1 %v2073_v61 }
0x1409   :  { %3968 = vmatprep.subr.mxu1 %v4206_v14 }
0x140a   :  { %v2060_v1 = vmul.f32 1.442695, %v2057_v63 }
0x140b   :  { %v2149_v35 = vpop.permute.xlu0 %2148  ;;  %v2227_v60 = vpop.permute.xlu1 %2226 }
0x140c   :  { %4160 = vpow2.f32 %v2060_v1  ;;  %3964 = vmatpush3.msra.mxu0 %v2149_v35 }
0x140d   :  { %3973 = vmatprep.subr.mxu0 %v4206_v14 }
0x140f   :  { %v2305_v62 = vpop.permute.xlu1 %2304 }
0x1412   :  { %v4159_v36 = vpop.eup %4158 }
0x1413   :  { %v2062_v2 = vsel %vm173_vm2, %v4159_v36, 0.0 }
0x1414   :  { %2063 = vadd.xlane.f32.xlu1 %v2062_v2 }
0x1416   :  { %v4161_v43 = vpop.eup %4160 }
0x1417   :  { %v2065_v3 = vsel %vm173_vm2, %v4161_v43, 0.0 }
0x1418   :  { %2066 = vadd.xlane.f32.xlu0 %v2065_v3 }
0x1425   :  { %2224 = vrot.lane.b32.xlu1 %v4672_v39, %s4211_s0 }
0x142e   :  { %2302 = vrot.lane.b32.xlu0 %v4674_v20, %s4211_s0  ;;  %s5016_s0 = smov 112  }
0x14a1   :  { %v2064_v0 = vpop.xlane.xlu1 %2063 }
0x14a2   :  { %4162 = vrcp.f32 %v2064_v0 }
0x14a5   :  { %v2067_v4 = vpop.xlane.xlu0 %2066  ;;  %v2225_v9 = vpop.permute.xlu1 %2224 }
0x14a6   :  { %4164 = vrcp.f32 %v2067_v4 }
0x14a9   :  { %v2303_v40 = vpop.permute.xlu0 %2302 }
0x14ac   :  { %v4163_v5 = vpop.eup %4162 }
0x14ad   :  { %v2070_v6 = vmul.f32 %v4163_v5, %v4159_v36 }
0x14af   :  { %3961 = vmatmul.mubr.msk.f32.vlgmr.msra.gmra.mrb[18].mxu1 %vm173_vm2, %v2070_v6 }
0x14b0   :  { %v4165_v7 = vpop.eup %4164  ;;  %3969 = vmatpush3.xpose.msk.msra.mxu1 %vm173_vm2, %v2227_v60  ;;  %3970 = vmatprep.mubr.msk.f32.mxu1 %vm4207_vm1, %v4206_v14 }
0x14b1   :  { %v2071_v8 = vmul.f32 %v4165_v7, %v4161_v43  ;;  %3978 = vmatprep.subr.mxu1 %v4206_v14 }
0x14b3   :  { %3966 = vmatmul.mubr.msk.f32.vlgmr.msra.gmra.mrb[30].mxu0 %vm173_vm2, %v2071_v8  ;;  %3971 = vmatmul.mubr.msk.f32.vlgmr.msra.gmra.mrb[28].mxu1 %vm173_vm2, %v2225_v9 }
0x14b4   :  { %3974 = vmatpush3.xpose.msk.msra.mxu0 %vm173_vm2, %v2305_v62  ;;  %3975 = vmatprep.mubr.msk.f32.mxu0 %vm4207_vm1, %v4206_v14 }
0x14b5   :  { %3983 = vmatprep.subr.mxu0 %v4206_v14  ;;  %3980 = vmatprep.mubr.msk.f32.mxu1 %vm4207_vm1, %v4206_v14 }
0x14b7   :  { %3976 = vmatmul.mubr.msk.f32.vlgmr.msra.gmra.mrb[32].mxu0 %vm173_vm2, %v2303_v40 }
0x14b8   :  { %3985 = vmatprep.mubr.msk.f32.mxu0 %vm4207_vm1, %v4206_v14 }
0x1582   :  { %v4728_v10 = vpop.f32.mrb[18].mxu1 }
0x1583   :  { %v3962_v11 = vpop.f32.mrb[19].mxu1 }
0x1586   :  { %v4730_v12 = vpop.f32.mrb[30].mxu0  ;;  %v2298_v13 = vpop.f32.mrb[28].mxu1 }
0x1587   :  { %v2380_v15 = vmul.f32 0.35355338, %v2298_v13  ;;  %v3967_v16 = vpop.f32.mrb[31].mxu0  ;;  %v3972_v17 = vpop.f32.mrb[29].mxu1 }
0x1589   :  { %v2382_v21 = vadd.f32 %v4735_v19, %v2380_v15 }
0x158a   :  { %v2376_v22 = vpop.f32.mrb[32].mxu0 }
0x158b   :  { %v2381_v23 = vmul.f32 0.35355338, %v2376_v22  ;;  %v3977_v24 = vpop.f32.mrb[33].mxu0  ;;  %v2384_v25 = vsel %vm173_vm2, %v2382_v21, -inf }
0x158c   :  { %2385 = vmax.xlane.f32.xlu1 %v2384_v25 }
0x158d   :  { %v2383_v27 = vadd.f32 %v4742_v26, %v2381_v23 }
0x158f   :  { %v2387_v28 = vsel %vm173_vm2, %v2383_v27, -inf }
0x1590   :  { %2388 = vmax.xlane.f32.xlu0 %v2387_v28 }
0x159d   :  { %2406 = vrot.lane.b32.xlu1 %v4672_v39, %s4212_s30 }
0x15a1   :  { %2560 = vrot.lane.b32.xlu1 %v4672_v39, %s4213_s20 }
0x15a5   :  { %2638 = vrot.lane.b32.xlu1 %v4674_v20, %s4213_s20  ;;  %s5019_s20 = smov 104  }
0x15a6   :  { %2482 = vrot.lane.b32.xlu0 %v4674_v20, %s4212_s30  ;;  %s5018_s30 = smov 72  }
0x15a9   :  { %2558 = vrot.lane.b32.xlu1 %v4672_v39, %s5016_s0 }
0x1619   :  { %v2386_v29 = vpop.xlane.xlu1 %2385 }
0x161a   :  { %v2390_v30 = vsub.f32 %v2382_v21, %v2386_v29 }
0x161c   :  { %v2392_v31 = vmul.f32 1.442695, %v2390_v30 }
0x161d   :  { %v2407_v34 = vpop.permute.xlu1 %2406  ;;  %v2389_v37 = vpop.xlane.xlu0 %2388 }
0x161e   :  { %4166 = vpow2.f32 %v2392_v31  ;;  %v2391_v38 = vsub.f32 %v2383_v27, %v2389_v37  ;;  %3979 = vmatpush3.msra.mxu1 %v2407_v34 }
0x161f   :  { %3988 = vmatprep.subr.mxu1 %v4206_v14 }
0x1620   :  { %v2394_v41 = vmul.f32 1.442695, %v2391_v38 }
0x1621   :  { %v2483_v18 = vpop.permute.xlu0 %2482  ;;  %v2561_v50 = vpop.permute.xlu1 %2560 }
0x1622   :  { %4168 = vpow2.f32 %v2394_v41  ;;  %3984 = vmatpush3.msra.mxu0 %v2483_v18 }
0x1623   :  { %3993 = vmatprep.subr.mxu0 %v4206_v14 }
0x1625   :  { %v2639_v52 = vpop.permute.xlu1 %2638 }
0x1628   :  { %v4167_v42 = vpop.eup %4166 }
0x1629   :  { %v2396_v44 = vsel %vm173_vm2, %v4167_v42, 0.0  ;;  %v2559_v57 = vpop.permute.xlu1 %2558 }
0x162a   :  { %2397 = vadd.xlane.f32.xlu0 %v2396_v44 }
0x162c   :  { %v4169_v45 = vpop.eup %4168 }
0x162d   :  { %v2399_v46 = vsel %vm173_vm2, %v4169_v45, 0.0 }
0x162e   :  { %2400 = vadd.xlane.f32.xlu0 %v2399_v46 }
0x1644   :  { %2636 = vrot.lane.b32.xlu0 %v4674_v20, %s5016_s0 }
0x16b7   :  { %v2398_v47 = vpop.xlane.xlu0 %2397 }
0x16b8   :  { %4170 = vrcp.f32 %v2398_v47 }
0x16bb   :  { %v2401_v49 = vpop.xlane.xlu0 %2400 }
0x16bc   :  { %4172 = vrcp.f32 %v2401_v49 }
0x16bf   :  { %v2637_v48 = vpop.permute.xlu0 %2636 }
0x16c2   :  { %v4171_v51 = vpop.eup %4170 }
0x16c3   :  { %v2404_v54 = vmul.f32 %v4171_v51, %v4167_v42 }
0x16c5   :  { %3981 = vmatmul.mubr.msk.f32.vlgmr.msra.gmra.mrb[30].mxu1 %vm173_vm2, %v2404_v54 }
0x16c6   :  { %v4173_v55 = vpop.eup %4172  ;;  %3989 = vmatpush3.xpose.msk.msra.mxu1 %vm173_vm2, %v2561_v50  ;;  %3990 = vmatprep.mubr.msk.f32.mxu1 %vm4207_vm1, %v4206_v14 }
0x16c7   :  { %v2405_v56 = vmul.f32 %v4173_v55, %v4169_v45  ;;  %3998 = vmatprep.subr.mxu1 %v4206_v14 }
0x16c9   :  { %3986 = vmatmul.mubr.msk.f32.vlgmr.msra.gmra.mrb[34].mxu0 %vm173_vm2, %v2405_v56  ;;  %3991 = vmatmul.mubr.msk.f32.vlgmr.msra.gmra.mrb[32].mxu1 %vm173_vm2, %v2559_v57 }
0x16ca   :  { %3994 = vmatpush3.xpose.msk.msra.mxu0 %vm173_vm2, %v2639_v52  ;;  %3995 = vmatprep.mubr.msk.f32.mxu0 %vm4207_vm1, %v4206_v14 }
0x16cb   :  { %4003 = vmatprep.subr.mxu0 %v4206_v14  ;;  %4000 = vmatprep.mubr.msk.f32.mxu1 %vm4207_vm1, %v4206_v14 }
0x16cd   :  { %3996 = vmatmul.mubr.msk.f32.vlgmr.msra.gmra.mrb[36].mxu0 %vm173_vm2, %v2637_v48 }
0x16ce   :  { %4005 = vmatprep.mubr.msk.f32.mxu0 %vm4207_vm1, %v4206_v14 }
0x1798   :  { %v4778_v58 = vpop.f32.mrb[30].mxu1 }
0x1799   :  { %v3982_v59 = vpop.f32.mrb[31].mxu1 }
0x179c   :  { %v4780_v61 = vpop.f32.mrb[34].mxu0  ;;  %v2632_v53 = vpop.f32.mrb[32].mxu1 }
0x179d   :  { %v4095_v63 = vpack.i.bf16 %v4780_v61, %v4778_v58  ;;  %v2714_v1 = vmul.f32 0.35355338, %v2632_v53  ;;  %v3987_v35 = vpop.f32.mrb[35].mxu0  ;;  %v3992_v36 = vpop.f32.mrb[33].mxu1 }
0x179f   :  { %v2716_v2 = vadd.f32 %v4735_v19, %v2714_v1 }
0x17a0   :  { %v2710_v43 = vpop.f32.mrb[36].mxu0 }
0x17a1   :  { %v2715_v3 = vmul.f32 0.35355338, %v2710_v43  ;;  %v3997_v60 = vpop.f32.mrb[37].mxu0  ;;  %v2718_v62 = vsel %vm173_vm2, %v2716_v2, -inf }
0x17a2   :  { %2719 = vmax.xlane.f32.xlu1 %v2718_v62  ;;  %v3695_v62 = vld [vmem:[%s4979_s6 + $0x28] sm:$0xff] }
0x17a3   :  { %v2717_v0 = vadd.f32 %v4742_v26, %v2715_v3 }
0x17a5   :  { %v2721_v4 = vsel %vm173_vm2, %v2717_v0, -inf }
0x17a6   :  { %2722 = vmax.xlane.f32.xlu0 %v2721_v4  ;;  %v3696_v4 = vld [vmem:[%s4979_s6 + $0x30] sm:$0xff] }
0x17b3   :  { %2740 = vrot.lane.b32.xlu1 %v4672_v39, %s5017_s1 }
0x17b7   :  { %2894 = vrot.lane.b32.xlu1 %v4672_v39, %s5018_s30 }
0x17bb   :  { %2972 = vrot.lane.b32.xlu1 %v4674_v20, %s5018_s30 }
0x17bc   :  { %2816 = vrot.lane.b32.xlu0 %v4674_v20, %s5017_s1 }
0x17bf   :  { %2892 = vrot.lane.b32.xlu1 %v4672_v39, %s5019_s20 }
0x182f   :  { %v2720_v5 = vpop.xlane.xlu1 %2719 }
0x1830   :  { %v2724_v6 = vsub.f32 %v2716_v2, %v2720_v5  ;;  %v3697_v5 = vld [vmem:[%s4979_s6 + $0x38] sm:$0xff] }
0x1832   :  { %v2726_v7 = vmul.f32 1.442695, %v2724_v6  ;;  %v3263_v6 = vpack.c.bf16 %v3697_v5, %v3696_v4  ;;  %v3704_v4 = vld [vmem:[%s4983_s9 + $0x1] ss:$0 sm:$0xff] }
0x1833   :  { %v2741_v8 = vpop.permute.xlu1 %2740  ;;  %v2723_v9 = vpop.xlane.xlu0 %2722 }
0x1834   :  { %4174 = vpow2.f32 %v2726_v7  ;;  %v2725_v40 = vsub.f32 %v2717_v0, %v2723_v9  ;;  %3999 = vmatpush3.msra.mxu1 %v2741_v8 }
0x1835   :  { %4008 = vmatprep.subr.mxu1 %v4206_v14 }
0x1836   :  { %v2728_v11 = vmul.f32 1.442695, %v2725_v40 }
0x1837   :  { %v2817_v13 = vpop.permute.xlu0 %2816  ;;  %v2895_v24 = vpop.permute.xlu1 %2894 }
0x1838   :  { %4176 = vpow2.f32 %v2728_v11  ;;  %4004 = vmatpush3.msra.mxu0 %v2817_v13 }
0x1839   :  { %4013 = vmatprep.subr.mxu0 %v4206_v14 }
0x183b   :  { %v2973_v27 = vpop.permute.xlu1 %2972 }
0x183e   :  { %v4175_v15 = vpop.eup %4174 }
0x183f   :  { %v2730_v16 = vsel %vm173_vm2, %v4175_v15, 0.0  ;;  %v2893_v31 = vpop.permute.xlu1 %2892 }
0x1840   :  { %2731 = vadd.xlane.f32.xlu0 %v2730_v16 }
0x1842   :  { %v4177_v17 = vpop.eup %4176 }
0x1843   :  { %v2733_v21 = vsel %vm173_vm2, %v4177_v17, 0.0 }
0x1844   :  { %2734 = vadd.xlane.f32.xlu0 %v2733_v21 }
0x185a   :  { %2970 = vrot.lane.b32.xlu0 %v4674_v20, %s5019_s20 }
0x18cd   :  { %v2732_v22 = vpop.xlane.xlu0 %2731 }
0x18ce   :  { %4178 = vrcp.f32 %v2732_v22 }
0x18d1   :  { %v2735_v23 = vpop.xlane.xlu0 %2734 }
0x18d2   :  { %4180 = vrcp.f32 %v2735_v23 }
0x18d5   :  { %v2971_v34 = vpop.permute.xlu0 %2970 }
0x18d8   :  { %v4179_v25 = vpop.eup %4178 }
0x18d9   :  { %v2738_v28 = vmul.f32 %v4179_v25, %v4175_v15 }
0x18db   :  { %4001 = vmatmul.mubr.msk.f32.vlgmr.msra.gmra.mrb[34].mxu1 %vm173_vm2, %v2738_v28 }
0x18dc   :  { %v4181_v29 = vpop.eup %4180  ;;  %4009 = vmatpush3.xpose.msk.msra.mxu1 %vm173_vm2, %v2895_v24  ;;  %4010 = vmatprep.mubr.msk.f32.mxu1 %vm4207_vm1, %v4206_v14 }
0x18dd   :  { %v2739_v30 = vmul.f32 %v4181_v29, %v4177_v17  ;;  %4018 = vmatprep.subr.mxu1 %v4206_v14 }
0x18df   :  { %4006 = vmatmul.mubr.msk.f32.vlgmr.msra.gmra.mrb[38].mxu0 %vm173_vm2, %v2739_v30  ;;  %4011 = vmatmul.mubr.msk.f32.vlgmr.msra.gmra.mrb[36].mxu1 %vm173_vm2, %v2893_v31 }
0x18e0   :  { %4014 = vmatpush3.xpose.msk.msra.mxu0 %vm173_vm2, %v2973_v27  ;;  %4015 = vmatprep.mubr.msk.f32.mxu0 %vm4207_vm1, %v4206_v14 }
0x18e1   :  { %4023 = vmatprep.subr.mxu0 %v4206_v14  ;;  %4020 = vmatprep.mubr.msk.f32.mxu1 %vm4207_vm1, %v4206_v14 }
0x18e3   :  { %4016 = vmatmul.mubr.msk.f32.vlgmr.msra.gmra.mrb[40].mxu0 %vm173_vm2, %v2971_v34 }
0x18e4   :  { %4025 = vmatprep.mubr.msk.f32.mxu0 %vm4207_vm1, %v4206_v14 }
0x19ae   :  { %v2812_v37 = vpop.f32.mrb[34].mxu1 }
0x19af   :  { %v4002_v38 = vpop.f32.mrb[35].mxu1 }
0x19b2   :  { %v2888_v41 = vpop.f32.mrb[38].mxu0  ;;  %v2966_v18 = vpop.f32.mrb[36].mxu1 }
0x19b3   :  { %v4100_v42 = vpack.i.bf16 %v2888_v41, %v2812_v37  ;;  %v3048_v44 = vmul.f32 0.35355338, %v2966_v18  ;;  %v4007_v45 = vpop.f32.mrb[39].mxu0  ;;  %v4012_v46 = vpop.f32.mrb[37].mxu1 }
0x19b5   :  { %v3050_v47 = vadd.f32 %v4735_v19, %v3048_v44 }
0x19b6   :  { %v3044_v49 = vpop.f32.mrb[40].mxu0 }
0x19b7   :  { %v3049_v50 = vmul.f32 0.35355338, %v3044_v49  ;;  %v4017_v51 = vpop.f32.mrb[41].mxu0  ;;  %v3052_v52 = vsel %vm173_vm2, %v3050_v47, -inf }
0x19b8   :  { %3053 = vmax.xlane.f32.xlu1 %v3052_v52 }
0x19b9   :  { %v3051_v54 = vadd.f32 %v4742_v26, %v3049_v50 }
0x19bb   :  { %v3055_v55 = vsel %vm173_vm2, %v3051_v54, -inf }
0x19bc   :  { %3056 = vmax.xlane.f32.xlu0 %v3055_v55 }
0x19c9   :  { %3074 = vrot.lane.b32.xlu1 %v4672_v39, %s5020_s27 }
0x19cd   :  { %4096 = vrot.lane.b32.xlu1 %v4095_v63, %s5021_s21 }
0x19d1   :  { %4101 = vrot.lane.b32.xlu1 %v4100_v42, %s5022_s4 }
0x1a45   :  { %v3054_v19 = vpop.xlane.xlu1 %3053 }
0x1a46   :  { %v3058_v56 = vsub.f32 %v3050_v47, %v3054_v19 }
0x1a48   :  { %v3060_v57 = vmul.f32 1.442695, %v3058_v56 }
0x1a49   :  { %v3075_v48 = vpop.permute.xlu1 %3074  ;;  %v3057_v59 = vpop.xlane.xlu0 %3056 }
0x1a4a   :  { %4182 = vpow2.f32 %v3060_v57  ;;  %v3059_v26 = vsub.f32 %v3051_v54, %v3057_v59  ;;  %4019 = vmatpush3.msra.mxu1 %v3075_v48  ;;  %v3706_v59 = vld [vmem:[%s4981_s10 + $0x28] sm:$0xff] }
0x1a4b   :  { %4028 = vmatprep.subr.bf16.mxu1 %v4206_v14 }
0x1a4c   :  { %v3062_v53 = vmul.f32 1.442695, %v3059_v26 }
0x1a4d   :  { %v4097_v13 = vpop.permute.xlu1 %4096 }
0x1a4e   :  { %4184 = vpow2.f32 %v3062_v53  ;;  %v4099_v16 = vunpack.i.h.bf16 %v4097_v13  ;;  %v4098_v17 = vunpack.i.l.bf16 %v4097_v13  ;;  %v3707_v53 = vld [vmem:[%s4981_s10 + $0x30] sm:$0xff] }
0x1a4f   :  { %v3714_v13 = vld [vmem:[%s4984_s12 + $0x50] sm:$0xff] }
0x1a50   :  { %v3251_v24 = vsel %vm173_vm2, %v4730_v12, %v4099_v16  ;;  %v3250_v25 = vsel %vm173_vm2, %v4728_v10, %v4098_v17  ;;  %v3699_v10 = vld [vmem:[%s4980_s7 + $0x1] ss:$0 sm:$0xff] }
0x1a51   :  { %v4102_v15 = vpop.permute.xlu1 %4101  ;;  %v3716_v17 = vld [vmem:[%s4984_s12 + $0x60] sm:$0xff] }
0x1a52   :  { %v4104_v21 = vunpack.i.h.bf16 %v4102_v15  ;;  %v4103_v22 = vunpack.i.l.bf16 %v4102_v15  ;;  %v3715_v15 = vld [vmem:[%s4984_s12 + $0x58] sm:$0xff] }
0x1a53   :  { %v3445_v16 = vpack.c.bf16 %v3715_v15, %v3714_v13  ;;  %v3726_v13 = vld [vmem:[%s4988_s15 + $0x1] ss:$0 sm:$0xff] }
0x1a54   :  { %v4183_v39 = vpop.eup %4182  ;;  %v3253_v29 = vsel %vm1543_vm3, %v3251_v24, %v4104_v21  ;;  %v3252_v30 = vsel %vm1543_vm3, %v3250_v25, %v4103_v22  ;;  %v3717_v21 = vld [vmem:[%s4984_s12 + $0x68] sm:$0xff]  ;;  %v3719_v24 = vld [vmem:[%s4984_s12 + $0x78] sm:$0xff] }
0x1a55   :  { %v3064_v1 = vsel %vm173_vm2, %v4183_v39, 0.0  ;;  %v3446_v22 = vpack.c.bf16 %v3717_v21, %v3716_v17 }
0x1a56   :  { %3065 = vadd.xlane.f32.xlu0 %v3064_v1 }
0x1a58   :  { %v4185_v58 = vpop.eup %4184 }
0x1a59   :  { %v3067_v61 = vsel %vm173_vm2, %v4185_v58, 0.0 }
0x1a5a   :  { %3068 = vadd.xlane.f32.xlu0 %v3067_v61 }
0x1a70   :  { %3150 = vrot.lane.b32.xlu0 %v4674_v20, %s5020_s27  ;;  %v3694_v20 = vld [vmem:[%s4979_s6 + $0x20] sm:$0xff] }
0x1a71   :  { %v3262_v0 = vpack.c.bf16 %v3695_v62, %v3694_v20 }
0x1ae3   :  { %v3066_v63 = vpop.xlane.xlu0 %3065 }
0x1ae4   :  { %4186 = vrcp.f32 %v3066_v63 }
0x1ae7   :  { %v3069_v35 = vpop.xlane.xlu0 %3068 }
0x1ae8   :  { %4188 = vrcp.f32 %v3069_v35 }
0x1aeb   :  { %v3151_v36 = vpop.permute.xlu0 %3150 }
0x1aec   :  { %4024 = vmatpush3.msra.mxu0 %v3151_v36 }
0x1aed   :  { %4036 = vmatprep.subr.bf16.mxu0 %v4206_v14 }
0x1aee   :  { %v4187_v2 = vpop.eup %4186 }
0x1aef   :  { %v3072_v43 = vmul.f32 %v4187_v2, %v4183_v39  ;;  %v3708_v39 = vld [vmem:[%s4981_s10 + $0x38] sm:$0xff] }
0x1af0   :  { %v3371_v1 = vpack.c.bf16 %v3708_v39, %v3707_v53 }
0x1af1   :  { %4021 = vmatmul.mubr.msk.f32.vlgmr.msra.gmra.mrb[38].mxu1 %vm173_vm2, %v3072_v43 }
0x1af2   :  { %v4189_v3 = vpop.eup %4188  ;;  %4032 = vmatprep.mubr.msk.bf16.mxu1 %vm4207_vm1, %v4206_v14  ;;  %4029 = vmatpush3.bf16.msra.mxu1 %v3262_v0 }
0x1af3   :  { %v3073_v60 = vmul.f32 %v4189_v3, %v4185_v58  ;;  %4030 = vmatprep.subr.bf16.mxu1 %v4206_v14 }
0x1af5   :  { %4026 = vmatmul.mubr.msk.f32.vlgmr.msra.gmra.mrb[42].mxu0 %vm173_vm2, %v3073_v60  ;;  %v3703_v60 = vld [vmem:[%s4982_s8 + $0x1] ss:$0 sm:$0xff] }
0x1af6   :  { %4040 = vmatprep.mubr.msk.bf16.mxu0 %vm4207_vm1, %v4206_v14  ;;  %4031 = vmatpush3.bf16.msra.mxu1 %v3263_v6 }
0x1af7   :  { %4044 = vmatprep.subr.bf16.mxu1 %v4206_v14 }
0x1bc4   :  { %v3146_v7 = vpop.f32.mrb[38].mxu1 }
0x1bc5   :  { %v4022_v8 = vpop.f32.mrb[39].mxu1 }
0x1bc8   :  { %v3222_v9 = vpop.f32.mrb[42].mxu0 }
0x1bc9   :  { %v4105_v40 = vpack.i.bf16 %v3222_v9, %v3146_v7  ;;  %v4027_v11 = vpop.f32.mrb[43].mxu0  ;;  %v3712_v9 = vld [vmem:[%s4984_s12 + $0x40] sm:$0xff] }
0x1bcb   :  { %4106 = vrot.lane.b32.xlu1 %v4105_v40, %s5023_s28  ;;  %v3713_v40 = vld [vmem:[%s4984_s12 + $0x48] sm:$0xff] }
0x1bcc   :  { %v3444_v11 = vpack.c.bf16 %v3713_v40, %v3712_v9 }
0x1c3d   :  { %v4107_v23 = vpop.permute.xlu1 %4106 }
0x1c3e   :  { %v4109_v27 = vunpack.i.h.bf16 %v4107_v23  ;;  %v4108_v28 = vunpack.i.l.bf16 %v4107_v23  ;;  %v3718_v23 = vld [vmem:[%s4984_s12 + $0x70] sm:$0xff] }
0x1c3f   :  { %v3447_v25 = vpack.c.bf16 %v3719_v24, %v3718_v23 }
0x1c40   :  { %v3255_v31 = vsel %vm1546_vm4, %v3253_v29, %v4109_v27  ;;  %v3254_v34 = vsel %vm1546_vm4, %v3252_v30, %v4108_v28  ;;  %v3710_v27 = vld [vmem:[%s4985_s11 + $0x1] ss:$0 sm:$0xff] }
0x1c41   :  { %v3261_v37 = vpack.c.bf16 %v3255_v31, %v3254_v34 }
0x1c43   :  { %4033 = vmatmul.mubr.msk.bf16.vlgmr.msra.gmra.mrb[40].mxu1 %vm66_vm0, %v3261_v37 }
0x1c44   :  { %4052 = vmatprep.mubr.msk.bf16.mxu1 %vm4207_vm1, %v4206_v14  ;;  %4045 = vmatpush3.bf16.msra.mxu1 %v3444_v11 }
0x1c45   :  { %4046 = vmatprep.subr.bf16.mxu1 %v4206_v14 }
0x1c48   :  { %4047 = vmatpush3.bf16.msra.mxu1 %v3445_v16 }
0x1c49   :  { %4048 = vmatprep.subr.bf16.mxu1 %v4206_v14 }
0x1c4c   :  { %4049 = vmatpush3.bf16.msra.mxu1 %v3446_v22 }
0x1c4d   :  { %4050 = vmatprep.subr.bf16.mxu1 %v4206_v14 }
0x1c50   :  { %4051 = vmatpush3.bf16.msra.mxu1 %v3447_v25 }
0x1d16   :  { %v3309_v12 = vpop.f32.mrb[40].mxu1 }
0x1d17   :  { %v3310_v38 = vadd.f32 %v3699_v10, %v3309_v12  ;;  %v4034_v41 = vpop.f32.mrb[41].mxu1 }
0x1d18   :  { %v3312_v18 = vpop.f32.mrb[42].mxu1 }
0x1d19   :  { %v3313_v42 = vadd.f32 %v3699_v10, %v3312_v18  ;;  %v4035_v44 = vpop.f32.mrb[43].mxu1  ;;  %v3316_v45 = vadd.f32 %v3310_v38, %v4660_v32 }
0x1d1b   :  { %v3322_v46 = vsel %vm66_vm0, %v3316_v45, 0.0  ;;  %v3317_v47 = vadd.f32 %v3313_v42, %v4662_v33  ;;  %v3705_v33 = vld [vmem:[%s4981_s10 + $0x20] sm:$0xff] }
0x1d1c   :  { %3323 = vadd.xlane.f32.xlu0 %v3322_v46  ;;  %v3370_v26 = vpack.c.bf16 %v3706_v59, %v3705_v33 }
0x1d1d   :  { %v3325_v49 = vsel %vm66_vm0, %v3317_v47, 0.0 }
0x1d1e   :  { %3326 = vadd.xlane.f32.xlu1 %v3325_v49  ;;  %4037 = vmatpush3.bf16.msra.mxu0 %v3370_v26 }
0x1d1f   :  { %4038 = vmatprep.subr.bf16.mxu0 %v4206_v14 }
0x1d22   :  { %4039 = vmatpush3.bf16.msra.mxu0 %v3371_v1 }
0x1d23   :  { %4056 = vmatprep.subr.bf16.mxu0 %v4206_v14 }
0x1da9   :  { %v3324_v50 = vpop.xlane.xlu0 %3323 }
0x1daa   :  { %v3328_v51 = vmul.f32 0.03125, %v3324_v50  ;;  %v3721_v50 = vld [vmem:[%s4986_s13 + $0x1] ss:$0 sm:$0xff] }
0x1dab   :  { %v3327_v52 = vpop.xlane.xlu1 %3326 }
0x1dac   :  { %v3330_v54 = vsub.f32 %v3316_v45, %v3328_v51  ;;  %v3329_v55 = vmul.f32 0.03125, %v3327_v52 }
0x1dae   :  { %v3331_v19 = vsub.f32 %v3317_v47, %v3329_v55  ;;  %v3332_v56 = vmul.f32 %v3330_v54, %v3330_v54 }
0x1db0   :  { %v3334_v57 = vsel %vm66_vm0, %v3332_v56, 0.0  ;;  %v3333_v48 = vmul.f32 %v3331_v19, %v3331_v19 }
0x1db1   :  { %3335 = vadd.xlane.f32.xlu0 %v3334_v57 }
0x1db2   :  { %v3337_v32 = vsel %vm66_vm0, %v3333_v48, 0.0 }
0x1db5   :  { %3338 = vadd.xlane.f32.xlu0 %v3337_v32 }
0x1e3e   :  { %v3336_v58 = vpop.xlane.xlu0 %3335 }
0x1e3f   :  { %v3340_v61 = vmul.f32 0.03125, %v3336_v58 }
0x1e41   :  { %v3342_v63 = vadd.f32 1e-12, %v3340_v61 }
0x1e42   :  { %v3339_v35 = vpop.xlane.xlu0 %3338 }
0x1e43   :  { %4190 = vrsqrt.f32 %v3342_v63  ;;  %v3341_v36 = vmul.f32 0.03125, %v3339_v35 }
0x1e45   :  { %v3343_v2 = vadd.f32 1e-12, %v3341_v36 }
0x1e47   :  { %4192 = vrsqrt.f32 %v3343_v2  ;;  %v3555_v2 = vld [vmem:[%s4989_s16] sm:$0xff] }
0x1e4d   :  { %v4191_v43 = vpop.eup %4190 }
0x1e4e   :  { %v3346_v3 = vmul.f32 %v4191_v43, %v3330_v54  ;;  %v3556_v43 = vld [vmem:[%s4989_s16 + $0x8] sm:$0xff] }
0x1e50   :  { %v3354_v62 = vmul.f32 %v3703_v60, %v3346_v3  ;;  %v3560_v3 = vpack.c.bf16 %v3556_v43, %v3555_v2 }
0x1e51   :  { %v4193_v20 = vpop.eup %4192 }
0x1e52   :  { %v3347_v0 = vmul.f32 %v4193_v20, %v3331_v19  ;;  %v3362_v6 = vadd.f32 %v3704_v4, %v3354_v62  ;;  %v3558_v20 = vld [vmem:[%s4989_s16 + $0x18] sm:$0xff] }
0x1e54   :  { %v3355_v5 = vmul.f32 %v3703_v60, %v3347_v0  ;;  %v3557_v60 = vld [vmem:[%s4989_s16 + $0x10] sm:$0xff] }
0x1e55   :  { %v3561_v62 = vpack.c.bf16 %v3558_v20, %v3557_v60 }
0x1e56   :  { %v3363_v7 = vadd.f32 %v3704_v4, %v3355_v5 }
0x1e58   :  { %v3369_v8 = vpack.c.bf16 %v3363_v7, %v3362_v6 }
0x1e5a   :  { %4041 = vmatmul.mubr.msk.bf16.vlgmr.msra.gmra.mrb[44].mxu0 %vm66_vm0, %v3369_v8 }
0x1e5b   :  { %4060 = vmatprep.mubr.msk.bf16.mxu0 %vm4207_vm1, %v4206_v14  ;;  %4057 = vmatpush3.bf16.msra.mxu0 %v3560_v3 }
0x1e5c   :  { %4058 = vmatprep.subr.bf16.mxu0 %v4206_v14  ;;  %v3725_v14 = vld [vmem:[%s4987_s14 + $0x1] ss:$0 sm:$0xff] }
0x1e5f   :  { %4059 = vmatpush3.bf16.msra.mxu0 %v3561_v62 }
0x1f2d   :  { %v3417_v28 = vpop.f32.mrb[44].mxu0 }
0x1f2e   :  { %v3418_v29 = vadd.f32 %v3710_v27, %v3417_v28  ;;  %v4042_v30 = vpop.f32.mrb[45].mxu0 }
0x1f2f   :  { %v3420_v31 = vpop.f32.mrb[46].mxu0 }
0x1f30   :  { %v3426_v34 = vmul.f32 0.70710677, %v3418_v29  ;;  %v3421_v37 = vadd.f32 %v3710_v27, %v3420_v31  ;;  %v4043_v10 = vpop.f32.mrb[47].mxu0  ;;  %v3424_v42 = vmul.f32 0.5, %v3418_v29  ;;  %v3727_v27 = vld [vmem:[%s4991_s17] ss:$0 sm:$0xff] }
0x1f32   :  { %4194 = verf.f32 %v3426_v34  ;;  %v3427_v12 = vmul.f32 0.70710677, %v3421_v37  ;;  %v3425_v44 = vmul.f32 0.5, %v3421_v37 }
0x1f34   :  { %4196 = verf.f32 %v3427_v12 }
0x1f3c   :  { %v4195_v38 = vpop.eup %4194 }
0x1f3d   :  { %v3430_v41 = vadd.f32 1.0, %v4195_v38 }
0x1f3e   :  { %v4197_v18 = vpop.eup %4196 }
0x1f3f   :  { %v3431_v45 = vadd.f32 1.0, %v4197_v18  ;;  %v3432_v46 = vmul.f32 %v3430_v41, %v3424_v42 }
0x1f41   :  { %v3433_v47 = vmul.f32 %v3431_v45, %v3425_v44 }
0x1f43   :  { %v3443_v49 = vpack.c.bf16 %v3433_v47, %v3432_v46 }
0x1f45   :  { %4053 = vmatmul.mubr.msk.bf16.vlgmr.msra.gmra.mrb[44].mxu1 %vm1741_vm5, %v3443_v49 }
0x2018   :  { %v3493_v51 = vpop.f32.mrb[44].mxu1 }
0x2019   :  { %v3494_v52 = vadd.f32 %v3721_v50, %v3493_v51  ;;  %v4054_v54 = vpop.f32.mrb[45].mxu1 }
0x201a   :  { %v3496_v55 = vpop.f32.mrb[46].mxu1 }
0x201b   :  { %v3500_v19 = vadd.f32 %v3494_v52, %v3362_v6  ;;  %v3497_v56 = vadd.f32 %v3721_v50, %v3496_v55  ;;  %v4055_v57 = vpop.f32.mrb[47].mxu1 }
0x201d   :  { %v3501_v48 = vadd.f32 %v3497_v56, %v3363_v7  ;;  %v3506_v32 = vsel %vm66_vm0, %v3500_v19, 0.0 }
0x201e   :  { %3507 = vadd.xlane.f32.xlu1 %v3506_v32 }
0x201f   :  { %v3509_v33 = vsel %vm66_vm0, %v3501_v48, 0.0 }
0x2020   :  { %3510 = vadd.xlane.f32.xlu0 %v3509_v33 }
0x20ab   :  { %v3508_v59 = vpop.xlane.xlu1 %3507 }
0x20ac   :  { %v3512_v26 = vmul.f32 0.03125, %v3508_v59 }
0x20ad   :  { %v3511_v53 = vpop.xlane.xlu0 %3510 }
0x20ae   :  { %v3514_v39 = vsub.f32 %v3500_v19, %v3512_v26  ;;  %v3513_v1 = vmul.f32 0.03125, %v3511_v53 }
0x20b0   :  { %v3515_v58 = vsub.f32 %v3501_v48, %v3513_v1  ;;  %v3516_v61 = vmul.f32 %v3514_v39, %v3514_v39 }
0x20b2   :  { %v3518_v63 = vsel %vm66_vm0, %v3516_v61, 0.0  ;;  %v3517_v35 = vmul.f32 %v3515_v58, %v3515_v58 }
0x20b3   :  { %3519 = vadd.xlane.f32.xlu1 %v3518_v63 }
0x20b4   :  { %v3521_v36 = vsel %vm66_vm0, %v3517_v35, 0.0 }
0x20b5   :  { %3522 = vadd.xlane.f32.xlu0 %v3521_v36 }
0x2140   :  { %v3520_v0 = vpop.xlane.xlu1 %3519 }
0x2141   :  { %v3524_v4 = vmul.f32 0.03125, %v3520_v0 }
0x2142   :  { %v3523_v5 = vpop.xlane.xlu0 %3522 }
0x2143   :  { %v3526_v6 = vadd.f32 1e-12, %v3524_v4  ;;  %v3525_v7 = vmul.f32 0.03125, %v3523_v5 }
0x2145   :  { %4198 = vrsqrt.f32 %v3526_v6  ;;  %v3527_v8 = vadd.f32 1e-12, %v3525_v7 }
0x2147   :  { %4200 = vrsqrt.f32 %v3527_v8 }
0x214f   :  { %v4199_v9 = vpop.eup %4198 }
0x2150   :  { %v3530_v40 = vmul.f32 %v4199_v9, %v3514_v39 }
0x2151   :  { %v4201_v11 = vpop.eup %4200 }
0x2152   :  { %v3538_v15 = vmul.f32 %v3725_v14, %v3530_v40  ;;  %v3531_v16 = vmul.f32 %v4201_v11, %v3515_v58 }
0x2154   :  { %v3546_v17 = vadd.f32 %v3726_v13, %v3538_v15  ;;  %v3539_v21 = vmul.f32 %v3725_v14, %v3531_v16 }
0x2156   :  { %3548 = vst.msk [vmem:[%s4990_s18] sm:$0xff] %vm66_vm0, %v3546_v17  ;;  %v3547_v22 = vadd.f32 %v3726_v13, %v3539_v21 }
0x2158   :  { %3549 = vst.msk [vmem:[%s4990_s18 + $0x8] sm:$0xff] %vm66_vm0, %v3547_v22  ;;  %v3551_v23 = vrot.slane %v3547_v22, 7 }
0x215a   :  { %v3554_v24 = vsel %vm3553_vm6, %v3546_v17, %v3551_v23 }
0x215b   :  { %v3559_v25 = vpack.c.bf16 %v3554_v24, %v3554_v24 }
0x215d   :  { %4061 = vmatmul.mubr.msk.bf16.vlgmr.msra.gmra.mrb[48].mxu0 %vm66_vm0, %v3559_v25 }
0x2230   :  { %v3606_v28 = vpop.f32.mrb[48].mxu0 }
0x2231   :  { %v3607_v29 = vadd.f32 %v3727_v27, %v3606_v28  ;;  %v4062_v30 = vpop.f32.mrb[49].mxu0 }
0x2232   :  { %v3609_v31 = vpop.f32.mrb[50].mxu0 }
0x2233   :  { %4202 = vtanh.f32 %v3607_v29  ;;  %v4063_v34 = vpop.f32.mrb[51].mxu0 }
0x223d   :  { %v4203_v37 = vpop.eup %4202 }
0x223e   :  { %3614 = vst.msk [vmem:[%s4992_s19] sm:$0x3] %vm3613_vm7, %v4203_v37 }

</bundles_post_ra>
